<compile_context>
chip_gen: v7x
topology: tpu7x:2x2x1
jax: 0.10.0
libtpu: 0.0.40
codegen_flags: <defaults>
</compile_context>

<pallas_src>
import functools

import jax
import jax.numpy as jnp
from jax.experimental import pallas as pl
from jax.experimental.pallas import tpu as pltpu


def _round_up(n: int, m: int) -> int:
    return ((n + m - 1) // m) * m


def neuralnet_kernel(x_ref, w1_ref, b1_ref, w2_ref, b2_ref, o_ref):
    # x_ref:  [tbr, 128]  packed x: lane 8*p + k = feature k of batch (16*row + p)
    # w1_ref: [128, 192]  block-diagonal layer-1 weights
    # b1_ref: [1, 192]    layer-1 bias tiled 16x (lane 12*p + j = b1[j])
    # w2_ref: [192, 16]   block-diagonal layer-2 weights
    # b2_ref: [1]         scalar layer-2 bias (SMEM)
    # o_ref:  [tbr, 16]   packed output: lane p = sigmoid output of batch (16*row + p)
    x = x_ref[...]

    # Layer 1 on the MXU (f32 multi-pass: keeps ~f32 accuracy, no bf16 downcast).
    h = jnp.dot(x, w1_ref[...],
                preferred_element_type=jnp.float32,
                precision=jax.lax.Precision.HIGHEST)            # [tbr, 192]
    h = jnp.maximum(h + b1_ref[...], 0.0)                       # bias + ReLU (VPU)

    # Layer 2 on the MXU: one value per batch element, still lane-packed.
    z = jnp.dot(h, w2_ref[...],
                preferred_element_type=jnp.float32,
                precision=jax.lax.Precision.HIGHEST)            # [tbr, 16]
    z = z + b2_ref[0]

    # Sigmoid on the EUP.
    o_ref[...] = jax.nn.sigmoid(z).astype(o_ref.dtype)


@functools.partial(jax.jit, static_argnames=("block_batch",))
def neuralnet_forward(x, w1, b1, w2, b2, *, block_batch=32768):
    """Forward pass of the 2-layer MLP (torch: Linear -> ReLU -> Linear -> Sigmoid).

    x:  [B, 8]   float32
    w1: [12, 8]  float32   (PyTorch hidden1.weight layout [out, in])
    b1: [12]     float32
    w2: [1, 12]  float32   (PyTorch hidden2.weight layout)
    b2: [1]      float32
    returns [B, 1] float32
    """
    B, in_f = x.shape
    hid = w1.shape[0]
    out_f = w2.shape[0]
    pack = 128 // in_f                      # 16 batch elements per 128-lane row
    assert pack * in_f == 128

    x = x.astype(jnp.float32)
    # Rare path: pad the batch to a multiple of 16 so the lane packing is exact.
    # For the common B % 16 == 0 case this is a no-op (zero extra HBM traffic).
    b_pad = _round_up(B, pack)
    if b_pad != B:
        x = jnp.pad(x, ((0, b_pad - B), (0, 0)))
    rows = b_pad // pack

    # Free, layout-preserving reshape (row-major): [B, 8] -> [B/16, 128].
    x_r = x.reshape(rows, pack * in_f)

    # Expand the tiny weights into block-diagonal packed form (a few 10s of KB,
    # computed once per call; resident in VMEM across all grid steps).
    eye = jnp.eye(pack, dtype=jnp.float32)
    w1f = w1.astype(jnp.float32)                          # [12, 8]
    w2f = w2.astype(jnp.float32).reshape(hid)             # [12]
    # w1big[8p + k, 12q + j] = w1[j, k] * (p == q)
    w1big = (eye[:, None, :, None] * w1f.T[None, :, None, :]
             ).reshape(pack * in_f, pack * hid)           # [128, 192]
    # b1big[0, 12q + j] = b1[j]
    b1big = jnp.tile(b1.astype(jnp.float32), pack).reshape(1, pack * hid)
    # w2big[12q + j, q'] = w2[0, j] * (q == q')
    w2big = (eye[:, None, :] * w2f[None, :, None]
             ).reshape(pack * hid, pack)                  # [192, 16]
    b2_s = b2.reshape(out_f).astype(jnp.float32)          # [1] -> SMEM

    # Batch tile: ~32K batch elements (2048 packed rows) per grid step; keep at
    # least 2 grid steps when possible so v7x's two TensorCores both get work.
    tbr = min(block_batch // pack, rows)
    if rows > 8:
        tbr = min(tbr, _round_up(pl.cdiv(rows, 2), 8))
    grid = (pl.cdiv(rows, tbr),)

    out_r = pl.pallas_call(
        neuralnet_kernel,
        out_shape=jax.ShapeDtypeStruct((rows, pack), jnp.float32),
        grid=grid,
        in_specs=[
            pl.BlockSpec((tbr, pack * in_f), lambda i: (i, 0)),         # x tile
            pl.BlockSpec((pack * in_f, pack * hid), lambda i: (0, 0)),  # w1big
            pl.BlockSpec((1, pack * hid), lambda i: (0, 0)),            # b1big
            pl.BlockSpec((pack * hid, pack), lambda i: (0, 0)),         # w2big
            pl.BlockSpec(memory_space=pltpu.MemorySpace.SMEM),          # b2 scalar
        ],
        out_specs=pl.BlockSpec((tbr, pack), lambda i: (i, 0)),
        compiler_params=pltpu.CompilerParams(
            dimension_semantics=("parallel",),
            vmem_limit_bytes=48 * 1024 * 1024,
        ),
    )(x_r, w1big, b1big, w2big, b2_s)

    # Free reshape back to the PyTorch-facing shape [B, 1]; slice only if padded.
    out = out_r.reshape(b_pad, out_f)
    return out[:B] if b_pad != B else out


if __name__ == "__main__":
    key = jax.random.PRNGKey(0)
    k_x, k_w1, k_b1, k_w2, k_b2 = jax.random.split(key, 5)

    IN_F, HID, OUT_F = 8, 12, 1

    # Deterministic "PyTorch-style" Linear init: U(-1/sqrt(in), 1/sqrt(in))
    bound1 = 1.0 / jnp.sqrt(float(IN_F))
    w1 = jax.random.uniform(k_w1, (HID, IN_F), jnp.float32, -bound1, bound1)
    b1 = jax.random.uniform(k_b1, (HID,), jnp.float32, -bound1, bound1)
    bound2 = 1.0 / jnp.sqrt(float(HID))
    w2 = jax.random.uniform(k_w2, (OUT_F, HID), jnp.float32, -bound2, bound2)
    b2 = jax.random.uniform(k_b2, (OUT_F,), jnp.float32, -bound2, bound2)

    def reference(xv):
        h = jnp.maximum(
            jnp.dot(xv, w1.T, precision=jax.lax.Precision.HIGHEST) + b1, 0.0)
        return jax.nn.sigmoid(
            jnp.dot(h, w2.T, precision=jax.lax.Precision.HIGHEST) + b2)

    # Small primary case, plus two shapes exercising the B % 16 != 0 padding
    # path and the multi-step / ragged-last-block grid path.
    for B in (64, 50, 2000):
        x = jax.random.normal(jax.random.fold_in(k_x, B), (B, IN_F), jnp.float32)
        out = neuralnet_forward(x, w1, b1, w2, b2)
        jax.block_until_ready(out)
        ref = reference(x)
        assert out.shape == (B, OUT_F), out.shape
        assert jnp.allclose(out, ref, atol=1e-5, rtol=1e-5), float(
            jnp.max(jnp.abs(out - ref)))

    print("KERNEL_OK")
</pallas_src>

<mosaic_0001>
module attributes {stable_mosaic.version = 11 : i64} {
  func.func @neuralnet_kernel(%arg0: i32, %arg1: memref<4x128xf32, #tpu.memory_space<vmem>>, %arg2: memref<128x192xf32, #tpu.memory_space<vmem>>, %arg3: memref<1x192xf32, #tpu.memory_space<vmem>>, %arg4: memref<192x16xf32, #tpu.memory_space<vmem>>, %arg5: memref<1xf32, #tpu.memory_space<smem>>, %arg6: memref<4x16xf32, #tpu.memory_space<vmem>>) attributes {dimension_semantics = [#tpu.dimension_semantics<parallel>], iteration_bounds = array<i64: 1>, scalar_prefetch = 0 : i64, scratch_operands = 0 : i64, tpu.core_type = #tpu.core_type<tc>, window_params = [{transform_indices = @transform_0, window_bounds = array<i64: 4, 128>}, {pipeline_mode = #tpu.pipeline_mode<synchronous>, transform_indices = @transform_1, window_bounds = array<i64: 128, 192>}, {pipeline_mode = #tpu.pipeline_mode<synchronous>, transform_indices = @transform_2, window_bounds = array<i64: 1, 192>}, {pipeline_mode = #tpu.pipeline_mode<synchronous>, transform_indices = @transform_3, window_bounds = array<i64: 192, 16>}, {transform_indices = @transform_4, window_bounds = array<i64: 1>}, {transform_indices = @transform_5, window_bounds = array<i64: 4, 16>}]} {
    %c0 = arith.constant 0 : index
    %c0_0 = arith.constant 0 : index
    %0 = vector.load %arg1[%c0, %c0_0] : memref<4x128xf32, #tpu.memory_space<vmem>>, vector<4x128xf32>
    %c0_1 = arith.constant 0 : index
    %c0_2 = arith.constant 0 : index
    %1 = vector.load %arg2[%c0_1, %c0_2] : memref<128x192xf32, #tpu.memory_space<vmem>>, vector<128x192xf32>
    %cst = arith.constant dense<0.000000e+00> : vector<4x192xf32>
    %2 = tpu.matmul %0, %1, %cst {dimension_numbers = #tpu.dot_dimension_numbers<[1], [0], [0], [1], [0, 0, 1, 1], [], []>, precision = #tpu.contract_precision<fp32>} : vector<4x128xf32>, vector<128x192xf32>, vector<4x192xf32> -> vector<4x192xf32>
    %c0_3 = arith.constant 0 : index
    %c0_4 = arith.constant 0 : index
    %3 = vector.load %arg3[%c0_3, %c0_4] : memref<1x192xf32, #tpu.memory_space<vmem>>, vector<1x192xf32>
    %4 = vector.broadcast %3 : vector<1x192xf32> to vector<4x192xf32>
    %5 = arith.addf %2, %4 : vector<4x192xf32>
    %cst_5 = arith.constant 0.000000e+00 : f32
    %6 = vector.broadcast %cst_5 : f32 to vector<4x192xf32>
    %7 = arith.maximumf %5, %6 : vector<4x192xf32>
    %c0_6 = arith.constant 0 : index
    %c0_7 = arith.constant 0 : index
    %8 = vector.load %arg4[%c0_6, %c0_7] : memref<192x16xf32, #tpu.memory_space<vmem>>, vector<192x16xf32>
    %cst_8 = arith.constant dense<0.000000e+00> : vector<4x16xf32>
    %9 = tpu.matmul %7, %8, %cst_8 {dimension_numbers = #tpu.dot_dimension_numbers<[1], [0], [0], [1], [0, 0, 1, 1], [], []>, precision = #tpu.contract_precision<fp32>} : vector<4x192xf32>, vector<192x16xf32>, vector<4x16xf32> -> vector<4x16xf32>
    %c0_9 = arith.constant 0 : index
    %10 = memref.load %arg5[%c0_9] : memref<1xf32, #tpu.memory_space<smem>>
    %11 = vector.broadcast %10 : f32 to vector<4x16xf32>
    %12 = arith.addf %9, %11 : vector<4x16xf32>
    %13 = arith.negf %12 : vector<4x16xf32>
    %14 = math.exp %13 : vector<4x16xf32>
    %cst_10 = arith.constant 1.000000e+00 : f32
    %15 = vector.broadcast %cst_10 : f32 to vector<4x16xf32>
    %16 = arith.addf %15, %14 : vector<4x16xf32>
    %17 = arith.divf %15, %16 : vector<4x16xf32>
    %c0_11 = arith.constant 0 : index
    %c0_12 = arith.constant 0 : index
    %18 = vector.load %arg6[%c0_11, %c0_12] : memref<4x16xf32, #tpu.memory_space<vmem>>, vector<4x16xf32>
    tpu.vector_store %arg6[%c0_11, %c0_12], %17 {strides = array<i32>} : memref<4x16xf32, #tpu.memory_space<vmem>>, vector<4x16xf32>,
    return
  }
  func.func @transform_0(%arg0: i32) -> (i32, i32) {
    %c0_i32 = arith.constant 0 : i32
    %c0_i32_0 = arith.constant 0 : i32
    return %arg0, %c0_i32 : i32, i32
  }
  func.func @transform_1(%arg0: i32) -> (i32, i32) {
    %c0_i32 = arith.constant 0 : i32
    %c0_i32_0 = arith.constant 0 : i32
    %c0_i32_1 = arith.constant 0 : i32
    return %c0_i32, %c0_i32_0 : i32, i32
  }
  func.func @transform_2(%arg0: i32) -> (i32, i32) {
    %c0_i32 = arith.constant 0 : i32
    %c0_i32_0 = arith.constant 0 : i32
    %c0_i32_1 = arith.constant 0 : i32
    return %c0_i32, %c0_i32_0 : i32, i32
  }
  func.func @transform_3(%arg0: i32) -> (i32, i32) {
    %c0_i32 = arith.constant 0 : i32
    %c0_i32_0 = arith.constant 0 : i32
    %c0_i32_1 = arith.constant 0 : i32
    return %c0_i32, %c0_i32_0 : i32, i32
  }
  func.func @transform_4(%arg0: i32) -> i32 {
    %c0_i32 = arith.constant 0 : i32
    %c0_i32_0 = arith.constant 0 : i32
    return %c0_i32 : i32
  }
  func.func @transform_5(%arg0: i32) -> (i32, i32) {
    %c0_i32 = arith.constant 0 : i32
    %c0_i32_0 = arith.constant 0 : i32
    return %arg0, %c0_i32 : i32, i32
  }
}

</mosaic_0001>

<bundles_post_ra>
// kernel: tile.9
= control target key start
LH: loop header
LB: loop body
LE: loop exit
PB: predicated region body
PF: predicated region fallthrough
CT: control target
= control target key end

     0   :  { %vm9_vm0 = vcmask 64512   ;;  %s150_s12 = smov 120   ;;  %s151_s13 = smov 96   ;;  %vm3_vm1 = vcmask 97280   ;;  %vm13_vm2 = vcmask 31744   ;;  %vm16_vm3 = vcmask 1048512   ;;  %s232_s0 = inlined_call_operand.vmem [shape: f32[16,12], index: 0, kind: input, shape index: {}]   ;;  %s233_s1 = inlined_call_operand.vmem [shape: f32[1,192], index: 1, kind: output, shape index: {}]  }
   0x1   :  { %v118_v0 = vld [vmem:[%s232_s0 + $0xa] sm:$0x1]   ;;  %v121_v3 = vld [vmem:[%s232_s0 + $0x8] sm:$0x1]   ;;  %v120_v4 = vld [vmem:[%s232_s0 + $0x9] sm:$0x1]  }
   0x2   :  { %v119_v1 = vld [vmem:[%s232_s0 + $0xa] sm:$0x1]   ;;  %26 = vrot.lane.b32.xlu1 %v121_v3, %s151_s13  ;;  %v122_v5 = vld [vmem:[%s232_s0 + $0x7] sm:$0x1]   ;;  %s152_s18 = smov 108   ;;  %s153_s19 = smov 84  }
   0x3   :  { %v10_v2 = vsel %vm9_vm0, %v119_v1, %v118_v0  ;;  %v123_v6 = vld [vmem:[%s232_s0 + $0x6] sm:$0x1]   ;;  %v124_v7 = vld [vmem:[%s232_s0 + $0x5] sm:$0x1]   ;;  %v2_v8 = vld [vmem:[%s232_s0] sm:$0x1]  }
   0x4   :  { %11 = vrot.lane.b32.xlu0 %v10_v2, %s150_s12  ;;  %4 = vst.msk [vmem:[#allocation0] sm:$0x1] %vm3_vm1, %v2_v8   ;;  %s154_s26 = smov 72   ;;  %s155_s27 = smov 60   ;;  %v125_v9 = vld [vmem:[%s232_s0 + $0xf] sm:$0x1]  }
   0x5   :  { %v126_v10 = vld [vmem:[%s232_s0 + $0x4] sm:$0x1]   ;;  %s156_s3 = smov 52   ;;  %s157_s4 = smov 48   ;;  %v127_v11 = vld [vmem:[%s232_s0 + $0xe] sm:$0x1]  }
   0x6   :  { %32 = vrot.lane.b32.xlu1 %v122_v5, %s153_s19  ;;  %v128_v12 = vld [vmem:[%s232_s0 + $0x3] sm:$0x1]   ;;  %s158_s9 = smov 40   ;;  %s159_s10 = smov 36   ;;  %v129_v13 = vld [vmem:[%s232_s0 + $0xd] sm:$0x1]  }
   0x7   :  { %v130_v14 = vld [vmem:[%s232_s0 + $0x2] sm:$0x1]   ;;  %s160_s15 = smov 28   ;;  %s161_s16 = smov 24   ;;  %v131_v15 = vld [vmem:[%s232_s0 + $0xc] sm:$0x1]  }
   0x8   :  { %20 = vrot.lane.b32.xlu0 %v120_v4, %s152_s18  ;;  %v132_v16 = vld [vmem:[%s232_s0 + $0x1] sm:$0x1]   ;;  %s162_s21 = smov 16   ;;  %s163_s22 = smov 12   ;;  %v133_v17 = vld [vmem:[%s232_s0 + $0xb] sm:$0x1]  }
   0x9   :  { %s164_s0 = smov 4   ;;  %vm22_vm4 = vcmask 982880   ;;  %vm28_vm5 = vcmask 884480   ;;  %vm34_vm6 = vcmask 786080   ;;  %vm40_vm7 = vcmask 687680  }
   0xa   :  { %44 = vrot.lane.b32.xlu1 %v124_v7, %s155_s27  ;;  %vm46_vm8 = vcmask 589280   ;;  %vm52_vm9 = vcmask 523680   ;;  %vm59_vm10 = vcmask 490880   ;;  %vm65_vm11 = vcmask 425280  }
   0xb   :  { %vm72_vm12 = vcmask 392480   ;;  %vm78_vm13 = vcmask 326880   ;;  %vm85_vm14 = vcmask 294080   ;;  %vm91_vm15 = vcmask 228480  }
   0xc   :  { %38 = vrot.lane.b32.xlu0 %v123_v6, %s154_s26  ;;  %vm98_vm0 = vcmask 195680   ;;  %vm104_vm1 = vcmask 130080  }
   0xe   :  { %57 = vrot.lane.b32.xlu1 %v126_v10, %s157_s4 }
  0x10   :  { %50 = vrot.lane.b32.xlu0 %v125_v9, %s156_s3 }
  0x12   :  { %70 = vrot.lane.b32.xlu1 %v128_v12, %s159_s10 }
  0x14   :  { %63 = vrot.lane.b32.xlu0 %v127_v11, %s158_s9 }
  0x16   :  { %83 = vrot.lane.b32.xlu1 %v130_v14, %s161_s16 }
  0x18   :  { %76 = vrot.lane.b32.xlu0 %v129_v13, %s160_s15 }
  0x1a   :  { %96 = vrot.lane.b32.xlu1 %v132_v16, %s163_s22 }
  0x1c   :  { %89 = vrot.lane.b32.xlu0 %v131_v15, %s162_s21 }
  0x20   :  { %102 = vrot.lane.b32.xlu0 %v133_v17, %s164_s0 }
  0x74   :  { %v27_v19 = vpop.permute.xlu1 %26  }
  0x76   :  { %v12_v18 = vpop.permute.xlu0 %11  }
  0x77   :  { %15 = vst.msk [vmem:[#allocation0 + $0x8] sm:$0x1] %vm13_vm2, %v12_v18  }
  0x78   :  { %17 = vst.msk [vmem:[#allocation0] sm:$0x1] %vm16_vm3, %v12_v18   ;;  %v33_v21 = vpop.permute.xlu1 %32  }
  0x7a   :  { %v21_v20 = vpop.permute.xlu0 %20  }
  0x7b   :  { %23 = vst.msk [vmem:[#allocation0] sm:$0x1] %vm22_vm4, %v21_v20  }
  0x7c   :  { %29 = vst.msk [vmem:[#allocation0] sm:$0x1] %vm28_vm5, %v27_v19   ;;  %v45_v23 = vpop.permute.xlu1 %44  }
  0x7d   :  { %35 = vst.msk [vmem:[#allocation0] sm:$0x1] %vm34_vm6, %v33_v21  }
  0x7e   :  { %v39_v22 = vpop.permute.xlu0 %38  }
  0x7f   :  { %41 = vst.msk [vmem:[#allocation0] sm:$0x1] %vm40_vm7, %v39_v22  }
  0x80   :  { %47 = vst.msk [vmem:[#allocation0] sm:$0x1] %vm46_vm8, %v45_v23   ;;  %v58_v25 = vpop.permute.xlu1 %57  }
  0x81   :  { %60 = vst.msk [vmem:[#allocation0] sm:$0x1] %vm59_vm10, %v58_v25  }
  0x82   :  { %v51_v24 = vpop.permute.xlu0 %50  }
  0x83   :  { %54 = vst.msk [vmem:[#allocation0 + $0x8] sm:$0x1] %vm52_vm9, %v51_v24  }
  0x84   :  { %v71_v27 = vpop.permute.xlu1 %70  }
  0x85   :  { %73 = vst.msk [vmem:[#allocation0] sm:$0x1] %vm72_vm12, %v71_v27  }
  0x86   :  { %v64_v26 = vpop.permute.xlu0 %63  }
  0x87   :  { %67 = vst.msk [vmem:[#allocation0 + $0x8] sm:$0x1] %vm65_vm11, %v64_v26  }
  0x88   :  { %v84_v29 = vpop.permute.xlu1 %83  }
  0x89   :  { %86 = vst.msk [vmem:[#allocation0] sm:$0x1] %vm85_vm14, %v84_v29  }
  0x8a   :  { %v77_v28 = vpop.permute.xlu0 %76  }
  0x8b   :  { %80 = vst.msk [vmem:[#allocation0 + $0x8] sm:$0x1] %vm78_vm13, %v77_v28  }
  0x8c   :  { %v97_v31 = vpop.permute.xlu1 %96  }
  0x8d   :  { %99 = vst.msk [vmem:[#allocation0] sm:$0x1] %vm98_vm0, %v97_v31  }
  0x8e   :  { %v90_v30 = vpop.permute.xlu0 %89  }
  0x8f   :  { %93 = vst.msk [vmem:[#allocation0 + $0x8] sm:$0x1] %vm91_vm15, %v90_v30  }
  0x92   :  { %v103_v32 = vpop.permute.xlu0 %102  }
  0x93   :  { %106 = vst.msk [vmem:[#allocation0 + $0x8] sm:$0x1] %vm104_vm1, %v103_v32  }
  0x94   :  { %v110_v33 = vld [vmem:[#allocation0] sm:$0x1] }
  0x95   :  { %112 = vst [vmem:[%s233_s1] sm:$0x1] %v110_v33 }
  0x9a   :  { %v114_v34 = vld [vmem:[#allocation0 + $0x8] sm:$0x1] }
  0x9b   :  { %134 = vst [vmem:[%s233_s1 + $0x1] sm:$0x1] %v114_v34 }

// kernel: neuralnet_forward.1
= control target key start
LH: loop header
LB: loop body
LE: loop exit
PB: predicated region body
PF: predicated region fallthrough
CT: control target
= control target key end

     0   :  { %v3220_v3 = vmov 0.0   ;;  %vm949_vm0 = vcmask 523264   ;;  %vm1717_vm1 = vcmask 125952   ;;  %s3212_s1 = inlined_call_operand.vmem [shape: f32[128,192], index: 1, kind: input, shape index: {}]   ;;  %s3213_s0 = inlined_call_operand.vmem [shape: f32[4,128], index: 0, kind: input, shape index: {}]   ;;  %s3214_s3 = inlined_call_operand.vmem [shape: f32[192,16], index: 3, kind: input, shape index: {}]   ;;  %s3215_s2 = inlined_call_operand.vmem [shape: f32[1,192], index: 2, kind: input, shape index: {}]   ;;  %s3216_s4 = inlined_call_operand.<no memory space> [shape: f32[1], index: 4, kind: input, shape index: {}]   ;;  %s3217_s5 = inlined_call_operand.vmem [shape: f32[4,16], index: 5, kind: output, shape index: {}]  }
   0x1   :  { %v23_v0 = vld [vmem:[%s3212_s1 + $0x8] sm:$0xff]  ;;  %v25_v1 = vld [vmem:[%s3212_s1 + $0x18] sm:$0xff]  ;;  %v22_v2 = vld [vmem:[%s3212_s1] sm:$0xff]  ;;  %162 = vmatprep.mubr.f32.mxu0 %v3220_v3 }
   0x2   :  { %v66_v4 = vand.u32 4294901760, %v23_v0  ;;  %v70_v5 = vand.u32 4294901760, %v25_v1  ;;  %v24_v6 = vld [vmem:[%s3212_s1 + $0x10] sm:$0xff]  ;;  %v68_v7 = vand.u32 4294901760, %v22_v2  ;;  %v27_v8 = vld [vmem:[%s3212_s1 + $0x28] sm:$0xff]  ;;  %v29_v9 = vld [vmem:[%s3212_s1 + $0x38] sm:$0xff] }
   0x3   :  { %v72_v10 = vand.u32 4294901760, %v24_v6  ;;  %v74_v11 = vand.u32 4294901760, %v27_v8  ;;  %v78_v12 = vand.u32 4294901760, %v29_v9  ;;  %v26_v13 = vld [vmem:[%s3212_s1 + $0x20] sm:$0xff]  ;;  %v28_v14 = vld [vmem:[%s3212_s1 + $0x30] sm:$0xff]  ;;  %v31_v15 = vld [vmem:[%s3212_s1 + $0x48] sm:$0xff] }
   0x4   :  { %v2220_v16 = vpack.c.bf16 %v70_v5, %v66_v4  ;;  %v33_v17 = vld [vmem:[%s3212_s1 + $0x58] sm:$0xff]  ;;  %v30_v18 = vld [vmem:[%s3212_s1 + $0x40] sm:$0xff]  ;;  %v32_v19 = vld [vmem:[%s3212_s1 + $0x50] sm:$0xff]  ;;  %v76_v23 = vand.u32 4294901760, %v26_v13  ;;  %v80_v24 = vand.u32 4294901760, %v28_v14  ;;  %v82_v25 = vand.u32 4294901760, %v31_v15 }
   0x5   :  { %v2231_v20 = vpack.c.bf16 %v72_v10, %v68_v7  ;;  %v2233_v21 = vpack.c.bf16 %v78_v12, %v74_v11  ;;  %v35_v22 = vld [vmem:[%s3212_s1 + $0x68] sm:$0xff]  ;;  %v86_v26 = vand.u32 4294901760, %v33_v17  ;;  %v84_v27 = vand.u32 4294901760, %v30_v18  ;;  %v37_v29 = vld [vmem:[%s3212_s1 + $0x78] sm:$0xff]  ;;  %v34_v30 = vld [vmem:[%s3212_s1 + $0x60] sm:$0xff] }
   0x6   :  { %3316 = vst [vmem:[#allocation3_spill] sm:$0xff] %v2220_v16  ;;  %1725 = vmatprep.subr.bf16.mxu0 %v2220_v16  ;;  %v88_v28 = vand.u32 4294901760, %v32_v19  ;;  %v2247_v31 = vpack.c.bf16 %v80_v24, %v76_v23  ;;  %v90_v32 = vand.u32 4294901760, %v35_v22  ;;  %v36_v33 = vld [vmem:[%s3212_s1 + $0x70] sm:$0xff]  ;;  %v39_v34 = vld [vmem:[%s3212_s1 + $0x88] sm:$0xff]  ;;  %v41_v35 = vld [vmem:[%s3212_s1 + $0x98] sm:$0xff]  ;;  %v2258_v36 = vsub.f32 %v23_v0, %v66_v4 }
   0x7   :  { %3317 = vst [vmem:[#allocation4_spill] sm:$0xff] %v2231_v20  ;;  %3318 = vst [vmem:[#allocation5_spill] sm:$0xff] %v2233_v21  ;;  %1727 = vmatpush1.bf16.msra.mxu0 %v2231_v20  ;;  %v2260_v37 = vsub.f32 %v25_v1, %v70_v5  ;;  %v2262_v38 = vsub.f32 %v22_v2, %v68_v7  ;;  %v2264_v39 = vpack.c.bf16 %v86_v26, %v82_v25  ;;  %v38_v48 = vld [vmem:[%s3212_s1 + $0x80] sm:$0xff]  ;;  %v40_v49 = vld [vmem:[%s3212_s1 + $0x90] sm:$0xff] }
   0x8   :  { %1729 = vmatprep.subr.bf16.mxu0 %v2233_v21  ;;  %3319 = vst [vmem:[#allocation6_spill] sm:$0xff] %v2247_v31  ;;  %v2266_v40 = vsub.f32 %v24_v6, %v72_v10  ;;  %v2268_v41 = vsub.f32 %v27_v8, %v74_v11  ;;  %v2270_v42 = vpack.c.bf16 %v88_v28, %v84_v27  ;;  %v94_v43 = vand.u32 4294901760, %v37_v29  ;;  %v43_v54 = vld [vmem:[%s3212_s1 + $0xa8] sm:$0xff]  ;;  %v45_v55 = vld [vmem:[%s3212_s1 + $0xb8] sm:$0xff]  ;;  %v42_v56 = vld [vmem:[%s3212_s1 + $0xa0] sm:$0xff] }
   0x9   :  { %3320 = vst [vmem:[#allocation7_spill] sm:$0xff] %v2264_v39  ;;  %v92_v44 = vand.u32 4294901760, %v34_v30  ;;  %v96_v45 = vand.u32 4294901760, %v36_v33  ;;  %v98_v46 = vand.u32 4294901760, %v39_v34  ;;  %v102_v47 = vand.u32 4294901760, %v41_v35  ;;  %v44_v61 = vld [vmem:[%s3212_s1 + $0xb0] sm:$0xff] }
   0xa   :  { %3321 = vst [vmem:[#allocation8_spill] sm:$0xff] %v2270_v42  ;;  %v2279_v50 = vsub.f32 %v29_v9, %v78_v12  ;;  %v2281_v51 = vsub.f32 %v26_v13, %v76_v23  ;;  %v2283_v52 = vsub.f32 %v28_v14, %v80_v24  ;;  %v2286_v53 = vpack.c.bf16 %v94_v43, %v90_v32  ;;  %v47_v62 = vld [vmem:[%s3212_s1 + $0xc8] sm:$0xff]  ;;  %v49_v63 = vld [vmem:[%s3212_s1 + $0xd8] sm:$0xff]  ;;  %v46_v9 = vld [vmem:[%s3212_s1 + $0xc0] sm:$0xff] }
   0xb   :  { %1731 = vmatpush1.bf16.msra.mxu0 %v2247_v31  ;;  %v2297_v57 = vsub.f32 %v31_v15, %v82_v25  ;;  %v2299_v58 = vsub.f32 %v33_v17, %v86_v26  ;;  %v2301_v59 = vsub.f32 %v30_v18, %v84_v27  ;;  %v2303_v60 = vsub.f32 %v32_v19, %v88_v28  ;;  %v48_v10 = vld [vmem:[%s3212_s1 + $0xd0] sm:$0xff]  ;;  %v21_v26 = vld [vmem:[%s3213_s0] sm:$0xf] }
   0xc   :  { %1733 = vmatprep.subr.bf16.mxu0 %v2264_v39  ;;  %3322 = vst [vmem:[#allocation9_spill] sm:$0xff] %v2286_v53  ;;  %v2314_v0 = vsub.f32 %v35_v22, %v90_v32  ;;  %v2316_v1 = vsub.f32 %v37_v29, %v94_v43  ;;  %v100_v2 = vand.u32 4294901760, %v38_v48  ;;  %v104_v4 = vand.u32 4294901760, %v40_v49  ;;  %v51_v43 = vld [vmem:[%s3212_s1 + $0xe8] sm:$0xff] }
   0xd   :  { %v2319_v5 = vpack.c.bf16 %v96_v45, %v92_v44  ;;  %v2321_v6 = vpack.c.bf16 %v102_v47, %v98_v46  ;;  %v106_v7 = vand.u32 4294901760, %v43_v54  ;;  %v110_v8 = vand.u32 4294901760, %v45_v55 }
   0xe   :  { %v108_v11 = vand.u32 4294901760, %v42_v56  ;;  %v112_v12 = vand.u32 4294901760, %v44_v61  ;;  %v114_v13 = vand.u32 4294901760, %v47_v62  ;;  %v118_v14 = vand.u32 4294901760, %v49_v63 }
   0xf   :  { %1735 = vmatpush1.bf16.msra.mxu0 %v2270_v42  ;;  %3323 = vst [vmem:[#allocation10_spill] sm:$0xff] %v2319_v5  ;;  %3324 = vst [vmem:[#allocation11_spill] sm:$0xff] %v2321_v6  ;;  %v2330_v15 = vsub.f32 %v34_v30, %v92_v44  ;;  %v2332_v17 = vsub.f32 %v36_v33, %v96_v45  ;;  %v2334_v18 = vsub.f32 %v39_v34, %v98_v46  ;;  %v53_v45 = vld [vmem:[%s3212_s1 + $0xf8] sm:$0xff] }
  0x10   :  { %1737 = vmatprep.subr.bf16.mxu0 %v2286_v53  ;;  %v2336_v19 = vsub.f32 %v41_v35, %v102_v47  ;;  %v2338_v22 = vpack.c.bf16 %v104_v4, %v100_v2  ;;  %v2340_v23 = vsub.f32 %v38_v48, %v100_v2  ;;  %v116_v24 = vand.u32 4294901760, %v46_v9 }
  0x11   :  { %v120_v25 = vand.u32 4294901760, %v48_v10  ;;  %v2346_v27 = vsub.f32 %v40_v49, %v104_v4  ;;  %v2348_v28 = vpack.c.bf16 %v110_v8, %v106_v7  ;;  %v2350_v29 = vsub.f32 %v43_v54, %v106_v7 }
  0x12   :  { %3325 = vst [vmem:[#allocation12_spill] sm:$0xff] %v2338_v22  ;;  %v2352_v30 = vsub.f32 %v45_v55, %v110_v8  ;;  %v2355_v32 = vpack.c.bf16 %v112_v12, %v108_v11  ;;  %v2357_v33 = vsub.f32 %v42_v56, %v108_v11  ;;  %v2359_v34 = vsub.f32 %v44_v61, %v112_v12  ;;  %v50_v56 = vld [vmem:[%s3212_s1 + $0xe0] sm:$0xff]  ;;  %v2387_v61 = vld [vmem:[%s3212_s1 + $0xf0] sm:$0xff] }
  0x13   :  { %1739 = vmatpush1.bf16.msra.mxu0 %v2319_v5  ;;  %3326 = vst [vmem:[#allocation13_spill] sm:$0xff] %v2348_v28  ;;  %v2361_v35 = vpack.c.bf16 %v118_v14, %v114_v13  ;;  %v2366_v44 = vsub.f32 %v47_v62, %v114_v13  ;;  %v3218_v46 = vand.u32 4294901760, %v2258_v36  ;;  %v3219_v47 = vand.u32 4294901760, %v2260_v37 }
  0x14   :  { %1741 = vmatprep.subr.bf16.mxu0 %v2321_v6  ;;  %3327 = vst [vmem:[#allocation14_spill] sm:$0xff] %v2355_v32  ;;  %v2373_v48 = vand.u32 4294901760, %v21_v26  ;;  %v2375_v49 = vsub.f32 %v49_v63, %v118_v14  ;;  %v2377_v54 = vpack.c.bf16 %v120_v25, %v116_v24  ;;  %v2379_v55 = vsub.f32 %v46_v9, %v116_v24 }
  0x15   :  { %3328 = vst [vmem:[#allocation15_spill] sm:$0xff] %v2361_v35  ;;  %v3222_v62 = vand.u32 4294901760, %v2262_v38  ;;  %v2391_v2 = vsub.f32 %v48_v10, %v120_v25  ;;  %v122_v63 = vand.u32 4294901760, %v51_v43  ;;  %v177_v4 = vsub.f32 %v2258_v36, %v3218_v46 }
  0x16   :  { %3329 = vst [vmem:[#allocation16_spill] sm:$0xff] %v2375_v49  ;;  %3330 = vst [vmem:[#allocation17_spill] sm:$0xff] %v2377_v54  ;;  %v189_v7 = vsub.f32 %v2260_v37, %v3219_v47  ;;  %v126_v8 = vand.u32 4294901760, %v53_v45  ;;  %v2401_v9 = vsub.f32 %v21_v26, %v2373_v48  ;;  %v3223_v11 = vand.u32 4294901760, %v2266_v40 }
  0x17   :  { %3331 = vst [vmem:[#allocation18_spill] sm:$0xff] %v2379_v55  ;;  %1743 = vmatpush1.bf16.msra.mxu0 %v2338_v22  ;;  %3332 = vst [vmem:[#allocation19_spill] sm:$0xff] %v2391_v2  ;;  %v3228_v10 = vand.u32 4294901760, %v2268_v41  ;;  %v124_v12 = vand.u32 4294901760, %v50_v56  ;;  %v3229_v14 = vand.u32 4294901760, %v2279_v50  ;;  %v178_v25 = vand.u32 4294901760, %v177_v4 }
  0x18   :  { %1745 = vmatprep.subr.bf16.mxu0 %v2348_v28  ;;  %3333 = vst [vmem:[#allocation20_spill] sm:$0xff] %v2401_v9  ;;  %v190_v46 = vand.u32 4294901760, %v189_v7  ;;  %v183_v26 = vsub.f32 %v2262_v38, %v3222_v62  ;;  %v195_v3 = vsub.f32 %v2266_v40, %v3223_v11  ;;  %v3238_v7 = vand.u32 4294901760, %v2283_v52 }
  0x19   :  { %v201_v13 = vsub.f32 %v2268_v41, %v3228_v10  ;;  %v213_v4 = vsub.f32 %v2279_v50, %v3229_v14  ;;  %v2424_v47 = vpack.c.bf16 %v126_v8, %v122_v63  ;;  %v2426_v62 = vsub.f32 %v51_v43, %v122_v63 }
  0x1a   :  { %v2428_v24 = vsub.f32 %v53_v45, %v126_v8  ;;  %v3337_v10 = vand.u32 4294901760, %v2281_v51  ;;  %v3243_v22 = vand.u32 4294901760, %v2299_v58  ;;  %v1756_v43 = vpack.c.bf16 %v190_v46, %v178_v25 }
  0x1b   :  { %1747 = vmatpush1.bf16.msra.mxu0 %v2355_v32  ;;  %3334 = vst [vmem:[#allocation21_spill] sm:$0xff] %v2424_v47  ;;  %v3335_v32 = vand.u32 4294901760, %v2387_v61  ;;  %v3338_v45 = vand.u32 4294901760, %v2401_v9  ;;  %v184_v8 = vand.u32 4294901760, %v183_v26  ;;  %v202_v6 = vand.u32 4294901760, %v201_v13 }
  0x1c   :  { %1749 = vmatprep.subr.bf16.mxu0 %v2361_v35  ;;  %v207_v14 = vsub.f32 %v2281_v51, %v3337_v10  ;;  %v219_v35 = vsub.f32 %v2283_v52, %v3238_v7  ;;  %v214_v5 = vand.u32 4294901760, %v213_v4  ;;  %v3246_v10 = vand.u32 4294901760, %v2303_v60 }
  0x1d   :  { %v2433_v28 = vpack.c.bf16 %v3335_v32, %v124_v12  ;;  %v166_v63 = vsub.f32 %v2401_v9, %v3338_v45  ;;  %v196_v32 = vand.u32 4294901760, %v195_v3  ;;  %v3339_v7 = vand.u32 4294901760, %v2297_v57 }
  0x1e   :  { %v237_v25 = vsub.f32 %v2299_v58, %v3243_v22  ;;  %v3251_v26 = vand.u32 4294901760, %v2314_v0  ;;  %v3256_v45 = vand.u32 4294901760, %v2316_v1  ;;  %v208_v11 = vand.u32 4294901760, %v207_v14 }
  0x1f   :  { %3336 = vst [vmem:[#allocation22_spill] sm:$0xff] %v2433_v28  ;;  %1751 = vmatpush1.bf16.msra.mxu0 %v2377_v54  ;;  %v225_v46 = vsub.f32 %v2297_v57, %v3339_v7  ;;  %v220_v3 = vand.u32 4294901760, %v219_v35  ;;  %v3340_v13 = vand.u32 4294901760, %v2301_v59  ;;  %v167_v54 = vand.u32 4294901760, %v166_v63 }
  0x20   :  { %1753 = vmatprep.subr.bf16.mxu0 %v2424_v47  ;;  %v243_v47 = vsub.f32 %v2303_v60, %v3246_v10  ;;  %v249_v7 = vsub.f32 %v2314_v0, %v3251_v26  ;;  %v261_v22 = vsub.f32 %v2316_v1, %v3256_v45  ;;  %v2471_v35 = vsub.f32 %v50_v56, %v124_v12 }
  0x21   :  { %v231_v4 = vsub.f32 %v2301_v59, %v3340_v13  ;;  %v1758_v13 = vpack.c.bf16 %v196_v32, %v184_v8  ;;  %v3267_v53 = vand.u32 4294901760, %v2332_v17  ;;  %v3261_v10 = vand.u32 4294901760, %v2334_v18 }
  0x22   :  { %v1760_v63 = vpack.c.bf16 %v214_v5, %v202_v6  ;;  %v226_v42 = vand.u32 4294901760, %v225_v46  ;;  %v238_v39 = vand.u32 4294901760, %v237_v25  ;;  %v3260_v26 = vand.u32 4294901760, %v2336_v19 }
  0x23   :  { %1755 = vmatpush1.bf16.msra.mxu0 %v2433_v28  ;;  %v1762_v31 = vpack.c.bf16 %v220_v3, %v208_v11  ;;  %v232_v21 = vand.u32 4294901760, %v231_v4  ;;  %v244_v45 = vand.u32 4294901760, %v243_v47  ;;  %v3259_v14 = vand.u32 4294901760, %v2340_v23 }
  0x24   :  { %1757 = vmatprep.subr.bf16.mxu0 %v1756_v43  ;;  %v250_v28 = vand.u32 4294901760, %v249_v7  ;;  %v262_v56 = vand.u32 4294901760, %v261_v22  ;;  %v3341_v12 = vand.u32 4294901760, %v2330_v15  ;;  %v3262_v32 = vand.u32 4294901760, %v2346_v27 }
  0x25   :  { %v267_v5 = vsub.f32 %v2332_v17, %v3267_v53  ;;  %v273_v6 = vsub.f32 %v2334_v18, %v3261_v10  ;;  %v285_v47 = vsub.f32 %v2336_v19, %v3260_v26  ;;  %v3342_v22 = vmov 0.0  }
  0x26   :  { %168 = vmatmul.mubr.f32.vlgmr.msra.gmra.mrb[0].mxu0 %v167_v54  ;;  %v255_v8 = vsub.f32 %v2330_v15, %v3341_v12  ;;  %v1764_v54 = vpack.c.bf16 %v238_v39, %v226_v42  ;;  %v279_v11 = vsub.f32 %v2340_v23, %v3259_v14  ;;  %v3266_v43 = vand.u32 4294901760, %v2350_v29 }
  0x27   :  { %1759 = vmatpush1.bf16.msra.mxu0 %v1758_v13  ;;  %398 = vmatprep.mubr.f32.mxu0 %v3342_v22  ;;  %v3265_v46 = vand.u32 4294901760, %v2352_v30  ;;  %v3343_v25 = vand.u32 4294901760, %v2387_v61  ;;  %v291_v4 = vsub.f32 %v2346_v27, %v3262_v32  ;;  %v3263_v7 = vand.u32 4294901760, %v2357_v33 }
  0x28   :  { %1761 = vmatprep.subr.bf16.mxu0 %v1760_v63  ;;  %v3264_v39 = vand.u32 4294901760, %v2359_v34  ;;  %v1766_v42 = vpack.c.bf16 %v244_v45, %v232_v21  ;;  %v1768_v13 = vpack.c.bf16 %v262_v56, %v250_v28  ;;  %v256_v63 = vand.u32 4294901760, %v255_v8 }
  0x29   :  { %v2499_v3 = vsub.f32 %v2387_v61, %v3343_v25  ;;  %v3270_v12 = vand.u32 4294901760, %v2366_v44  ;;  %v268_v14 = vand.u32 4294901760, %v267_v5  ;;  %v274_v26 = vand.u32 4294901760, %v273_v6 }
  0x2a   :  { %v286_v10 = vand.u32 4294901760, %v285_v47  ;;  %v332_v61 = vand.u32 4294901760, %v2375_v49  ;;  %v280_v25 = vand.u32 4294901760, %v279_v11  ;;  %v297_v32 = vsub.f32 %v2350_v29, %v3266_v43 }
  0x2b   :  { %1763 = vmatpush1.bf16.msra.mxu0 %v1762_v31  ;;  %v309_v21 = vsub.f32 %v2352_v30, %v3265_v46  ;;  %v326_v28 = vand.u32 4294901760, %v2379_v55  ;;  %v292_v45 = vand.u32 4294901760, %v291_v4  ;;  %v303_v31 = vsub.f32 %v2357_v33, %v3263_v7 }
  0x2c   :  { %1765 = vmatprep.subr.bf16.mxu0 %v1764_v54  ;;  %v315_v56 = vsub.f32 %v2359_v34, %v3264_v39  ;;  %v338_v8 = vand.u32 4294901760, %v2391_v2  ;;  %v321_v5 = vsub.f32 %v2366_v44, %v3270_v12  ;;  %v333_v6 = vsub.f32 %v2375_v49, %v332_v61 }
  0x2d   :  { %v344_v47 = vand.u32 4294901760, %v2426_v62  ;;  %v356_v54 = vand.u32 4294901760, %v2428_v24  ;;  %v1770_v11 = vpack.c.bf16 %v268_v14, %v256_v63  ;;  %v327_v4 = vsub.f32 %v2379_v55, %v326_v28 }
  0x2e   :  { %v339_v7 = vsub.f32 %v2391_v2, %v338_v8  ;;  %v350_v39 = vand.u32 4294901760, %v2471_v35  ;;  %v1772_v46 = vpack.c.bf16 %v286_v10, %v274_v26  ;;  %v298_v43 = vand.u32 4294901760, %v297_v32 }
  0x2f   :  { %1767 = vmatpush1.bf16.msra.mxu0 %v1766_v42  ;;  %v310_v53 = vand.u32 4294901760, %v309_v21  ;;  %v1774_v20 = vpack.c.bf16 %v292_v45, %v280_v25  ;;  %v304_v12 = vand.u32 4294901760, %v303_v31  ;;  %v316_v9 = vand.u32 4294901760, %v315_v56 }
  0x30   :  { %1769 = vmatprep.subr.bf16.mxu0 %v1768_v13  ;;  %v322_v16 = vand.u32 4294901760, %v321_v5  ;;  %v334_v49 = vand.u32 4294901760, %v333_v6  ;;  %v345_v22 = vsub.f32 %v2426_v62, %v344_v47  ;;  %v357_v42 = vsub.f32 %v2428_v24, %v356_v54 }
  0x31   :  { %v328_v14 = vand.u32 4294901760, %v327_v4  ;;  %v340_v63 = vand.u32 4294901760, %v339_v7  ;;  %v351_v2 = vsub.f32 %v2471_v35, %v350_v39  ;;  %v362_v55 = vand.u32 4294901760, %v2499_v3 }
  0x32   :  { %v1776_v10 = vpack.c.bf16 %v310_v53, %v298_v43  ;;  %v1778_v26 = vpack.c.bf16 %v316_v9, %v304_v12  ;;  %v1780_v32 = vpack.c.bf16 %v334_v49, %v322_v16  ;;  %v346_v13 = vand.u32 4294901760, %v345_v22 }
  0x33   :  { %1771 = vmatpush1.bf16.msra.mxu0 %v1770_v11  ;;  %v358_v25 = vand.u32 4294901760, %v357_v42  ;;  %v1782_v21 = vpack.c.bf16 %v340_v63, %v328_v14  ;;  %v352_v45 = vand.u32 4294901760, %v351_v2  ;;  %v363_v31 = vsub.f32 %v2499_v3, %v362_v55 }
  0x34   :  { %1773 = vmatprep.subr.bf16.mxu0 %v1772_v46  ;;  %v3344_v56 = vand.u32 4294901760, %v2258_v36  ;;  %v3345_v5 = vand.u32 4294901760, %v2260_v37  ;;  %v3346_v6 = vand.u32 4294901760, %v2262_v38  ;;  %v3347_v53 = vand.u32 4294901760, %v2266_v40 }
  0x35   :  { %v3348_v16 = vand.u32 4294901760, %v2268_v41  ;;  %v3350_v2 = vand.u32 4294901760, %v2281_v51  ;;  %v3351_v22 = vand.u32 4294901760, %v2283_v52  ;;  %v3352_v46 = vand.u32 4294901760, %v2297_v57 }
  0x36   :  { %v2540_v7 = vpack.c.bf16 %v3345_v5, %v3344_v56  ;;  %v2546_v9 = vpack.c.bf16 %v3347_v53, %v3346_v6  ;;  %v3353_v12 = vand.u32 4294901760, %v2299_v58  ;;  %v3354_v4 = vand.u32 4294901760, %v2301_v59 }
  0x37   :  { %1775 = vmatpush1.bf16.msra.mxu0 %v1774_v20  ;;  %v3349_v20 = vand.u32 4294901760, %v2279_v50  ;;  %v2558_v43 = vpack.c.bf16 %v3351_v22, %v3350_v2  ;;  %v3355_v42 = vand.u32 4294901760, %v2303_v60  ;;  %v3356_v63 = vand.u32 4294901760, %v2314_v0 }
  0x38   :  { %1777 = vmatprep.subr.bf16.mxu0 %v1776_v10  ;;  %v2564_v11 = vpack.c.bf16 %v3353_v12, %v3352_v46  ;;  %v3357_v10 = vand.u32 4294901760, %v2316_v1  ;;  %v3358_v5 = vand.u32 4294901760, %v2330_v15  ;;  %v3359_v6 = vand.u32 4294901760, %v2332_v17 }
  0x39   :  { %v2552_v49 = vpack.c.bf16 %v3349_v20, %v3348_v16  ;;  %v2570_v14 = vpack.c.bf16 %v3355_v42, %v3354_v4  ;;  %v3360_v16 = vand.u32 4294901760, %v2334_v18  ;;  %v3361_v20 = vand.u32 4294901760, %v2336_v19 }
  0x3a   :  { %v2576_v56 = vpack.c.bf16 %v3357_v10, %v3356_v63  ;;  %v2582_v53 = vpack.c.bf16 %v3359_v6, %v3358_v5  ;;  %v3363_v22 = vand.u32 4294901760, %v2340_v23  ;;  %v3364_v46 = vand.u32 4294901760, %v2346_v27 }
  0x3b   :  { %v2588_v2 = vpack.c.bf16 %v3361_v20, %v3360_v16  ;;  %v3366_v4 = vand.u32 4294901760, %v2350_v29  ;;  %v3367_v42 = vand.u32 4294901760, %v2352_v30  ;;  %v3368_v10 = vand.u32 4294901760, %v2357_v33  ;;  %1779 = vmatpush1.bf16.msra.mxu0 %v1778_v26 }
  0x3c   :  { %v2594_v12 = vpack.c.bf16 %v3364_v46, %v3363_v22  ;;  %v3369_v5 = vand.u32 4294901760, %v2359_v34  ;;  %v3370_v16 = vand.u32 4294901760, %v2366_v44  ;;  %v2612_v22 = vpack.c.bf16 %v338_v8, %v326_v28  ;;  %1781 = vmatprep.subr.bf16.mxu0 %v1780_v32 }
  0x3d   :  { %3362 = vst [vmem:[#allocation23_spill] sm:$0xff] %v2588_v2  ;;  %v2600_v63 = vpack.c.bf16 %v3367_v42, %v3366_v4  ;;  %v364_v2 = vand.u32 4294901760, %v363_v31  ;;  %v2614_v46 = vpack.c.bf16 %v356_v54, %v344_v47  ;;  %v1784_v4 = vpack.c.bf16 %v358_v25, %v346_v13  ;;  %v927_v47 = vld [vmem:[%s3214_s3 + $0x20] sm:$0xff]  ;;  %v928_v54 = vld [vmem:[%s3214_s3 + $0x28] sm:$0xff] }
  0x3e   :  { %3365 = vst [vmem:[#allocation24_spill] sm:$0xff] %v2594_v12  ;;  %v2606_v6 = vpack.c.bf16 %v3369_v5, %v3368_v10  ;;  %v2610_v20 = vpack.c.bf16 %v332_v61, %v3370_v16  ;;  %v2616_v12 = vpack.c.bf16 %v362_v55, %v350_v39  ;;  %v1788_v10 = vpack.c.bf16 %v2260_v37, %v2258_v36 }
  0x3f   :  { %1783 = vmatpush1.bf16.msra.mxu0 %v1782_v21  ;;  %v1786_v42 = vpack.c.bf16 %v364_v2, %v352_v45  ;;  %v1790_v61 = vpack.c.bf16 %v2266_v40, %v2262_v38  ;;  %v1792_v28 = vpack.c.bf16 %v2279_v50, %v2268_v41  ;;  %v1794_v55 = vpack.c.bf16 %v2283_v52, %v2281_v51  ;;  %v923_v50 = vld [vmem:[%s3214_s3] sm:$0xff]  ;;  %v924_v51 = vld [vmem:[%s3214_s3 + $0x8] sm:$0xff]  ;;  %v925_v52 = vld [vmem:[%s3214_s3 + $0x10] sm:$0xff] }
  0x40   :  { %1785 = vmatprep.subr.bf16.mxu0 %v1784_v4  ;;  %v1796_v39 = vpack.c.bf16 %v2299_v58, %v2297_v57  ;;  %v1798_v8 = vpack.c.bf16 %v2303_v60, %v2301_v59  ;;  %v1800_v36 = vpack.c.bf16 %v2316_v1, %v2314_v0  ;;  %v3371_v41 = vmov 0.0   ;;  %v926_v0 = vld [vmem:[%s3214_s3 + $0x18] sm:$0xff]  ;;  %v2666_v21 = vld [vmem:[%s3214_s3 + $0x30] sm:$0xff] }
  0x41   :  { %v3283_v58 = vmov 0.0|0.0   ;;  %v954_v59 = vand.u32 4294901760, %v923_v50  ;;  %v957_v60 = vand.u32 4294901760, %v924_v51  ;;  %v960_v1 = vand.u32 4294901760, %v925_v52  ;;  %v930_v45 = vld [vmem:[%s3214_s3 + $0x38] sm:$0xff] }
  0x42   :  { %1952 = vmatprep.subr.bf16.mxu1 %v3283_v58  ;;  %v963_v32 = vand.u32 4294901760, %v926_v0  ;;  %v966_v13 = vand.u32 4294901760, %v927_v47  ;;  %v969_v25 = vand.u32 4294901760, %v928_v54 }
  0x43   :  { %1787 = vmatpush1.bf16.msra.mxu0 %v1786_v42  ;;  %v2671_v31 = vsub.f32 %v923_v50, %v954_v59  ;;  %v2673_v2 = vsub.f32 %v924_v51, %v957_v60  ;;  %v2675_v5 = vsub.f32 %v925_v52, %v960_v1  ;;  %v2677_v16 = vpack.c.bf16 %v957_v60, %v954_v59 }
  0x44   :  { %1789 = vmatprep.subr.bf16.mxu0 %v1788_v10  ;;  %v2679_v4 = vsub.f32 %v926_v0, %v963_v32  ;;  %v2681_v42 = vsub.f32 %v927_v47, %v966_v13  ;;  %v2683_v10 = vsub.f32 %v928_v54, %v969_v25  ;;  %v975_v52 = vand.u32 4294901760, %v930_v45 }
  0x45   :  { %v3279_v50 = vand.u32 4294901760, %v2673_v2  ;;  %v3280_v51 = vand.u32 4294901760, %v2675_v5 }
  0x46   :  { %400 = vmatmul.mubr.f32.vlgmr.msra.gmra.mrb[0].mxu0 %v2373_v48  ;;  %3372 = vst [vmem:[#allocation25_spill] sm:$0xff] %v2681_v42  ;;  %3373 = vst [vmem:[#allocation26_spill] sm:$0xff] %v2683_v10  ;;  %v3281_v59 = vand.u32 4294901760, %v2679_v4  ;;  %v3285_v60 = vand.u32 4294901760, %v2683_v10  ;;  %v2704_v26 = vsub.f32 %v930_v45, %v975_v52  ;;  %v931_v45 = vld [vmem:[%s3214_s3 + $0x40] sm:$0xff] }
  0x47   :  { %1791 = vmatpush1.bf16.msra.mxu0 %v1790_v61  ;;  %534 = vmatprep.mubr.f32.mxu0 %v3371_v41  ;;  %v972_v61 = vand.u32 4294901760, %v2666_v21  ;;  %v1068_v47 = vsub.f32 %v2673_v2, %v3279_v50  ;;  %v1075_v54 = vsub.f32 %v2675_v5, %v3280_v51 }
  0x48   :  { %1793 = vmatprep.subr.bf16.mxu0 %v1792_v28  ;;  %v3278_v28 = vand.u32 4294901760, %v2671_v31  ;;  %3375 = vst [vmem:[#allocation28_spill] sm:$0xff] %v2704_v26 }
  0x49   :  { %v2693_v0 = vsub.f32 %v2666_v21, %v972_v61  ;;  %v1082_v21 = vsub.f32 %v2679_v4, %v3281_v59  ;;  %v1069_v51 = vand.u32 4294901760, %v1068_v47  ;;  %v1076_v40 = vand.u32 4294901760, %v1075_v54 }
  0x4a   :  { %v3291_v59 = vand.u32 4294901760, %v2704_v26  ;;  %v2732_v54 = vpack.c.bf16 %v963_v32, %v960_v1 }
  0x4b   :  { %1795 = vmatpush1.bf16.msra.mxu0 %v1794_v55  ;;  %v3282_v55 = vand.u32 4294901760, %v2681_v42  ;;  %3374 = vst [vmem:[#allocation27_spill] sm:$0xff] %v2693_v0  ;;  %v3288_v50 = vand.u32 4294901760, %v2693_v0  ;;  %v1083_v58 = vand.u32 4294901760, %v1082_v21  ;;  %v3377_v21 = vld [vmem:[#allocation16_spill] sm:$0xff] }
  0x4c   :  { %1797 = vmatprep.subr.bf16.mxu0 %v1796_v39  ;;  %v1061_v39 = vsub.f32 %v2671_v31, %v3278_v28  ;;  %v1096_v28 = vsub.f32 %v2683_v10, %v3285_v60  ;;  %v1110_v47 = vsub.f32 %v2704_v26, %v3291_v59  ;;  %v978_v10 = vand.u32 4294901760, %v931_v45 }
  0x4d   :  { %v1089_v57 = vsub.f32 %v2681_v42, %v3282_v55  ;;  %v932_v55 = vld [vmem:[%s3214_s3 + $0x48] sm:$0xff]  ;;  %v1103_v60 = vsub.f32 %v2693_v0, %v3288_v50  ;;  %v1812_v50 = vpack.c.bf16 %v3377_v21, %v2366_v44  ;;  %v1956_v0 = vpack.c.bf16 %v1083_v58, %v1076_v40 }
  0x4e   :  { %v1097_v37 = vand.u32 4294901760, %v1096_v28  ;;  %v3376_v28 = vpack.c.bf16 %v2332_v17, %v2330_v15  ;;  %v3378_v59 = vpack.c.bf16 %v2336_v19, %v2334_v18  ;;  %v2745_v32 = vsub.f32 %v931_v45, %v978_v10  ;;  %v935_v15 = vld [vmem:[%s3214_s3 + $0x60] sm:$0xff]  ;;  %v936_v17 = vld [vmem:[%s3214_s3 + $0x68] sm:$0xff] }
  0x4f   :  { %1799 = vmatpush1.bf16.msra.mxu0 %v1798_v8  ;;  %v1062_v8 = vand.u32 4294901760, %v1061_v39  ;;  %v1090_v38 = vand.u32 4294901760, %v1089_v57  ;;  %v934_v57 = vld [vmem:[%s3214_s3 + $0x58] sm:$0xff]  ;;  %v1104_v1 = vand.u32 4294901760, %v1103_v60  ;;  %v2747_v26 = vpack.c.bf16 %v969_v25, %v966_v13 }
  0x50   :  { %1801 = vmatprep.subr.bf16.mxu0 %v1800_v36  ;;  %v933_v36 = vld [vmem:[%s3214_s3 + $0x50] sm:$0xff]  ;;  %v3379_v44 = vmov 0.0|0.0   ;;  %v987_v18 = vand.u32 4294901760, %v934_v57  ;;  %v2758_v19 = vpack.c.bf16 %v975_v52, %v972_v61  ;;  %v1111_v40 = vand.u32 4294901760, %v1110_v47 }
  0x51   :  { %v1953_v39 = vpack.c.bf16 %v1069_v51, %v1062_v8  ;;  %v1959_v51 = vpack.c.bf16 %v1097_v37, %v1090_v38  ;;  %v981_v8 = vand.u32 4294901760, %v932_v55  ;;  %v984_v42 = vand.u32 4294901760, %v933_v36 }
  0x52   :  { %v990_v38 = vand.u32 4294901760, %v935_v15  ;;  %v3301_v58 = vand.u32 4294901760, %v2745_v32  ;;  %v993_v25 = vand.u32 4294901760, %v936_v17  ;;  %v2767_v45 = vsub.f32 %v934_v57, %v987_v18 }
  0x53   :  { %1803 = vmatpush1.bf16.msra.mxu0 %v3376_v28  ;;  %1954 = vmatpush1.bf16.msra.mxu1 %v1953_v39  ;;  %v2756_v37 = vsub.f32 %v932_v55, %v981_v8  ;;  %v2761_v13 = vsub.f32 %v933_v36, %v984_v42  ;;  %v2771_v39 = vpack.c.bf16 %v981_v8, %v978_v10  ;;  %v937_v36 = vld [vmem:[%s3214_s3 + $0x70] sm:$0xff]  ;;  %v938_v10 = vld [vmem:[%s3214_s3 + $0x78] sm:$0xff] }
  0x54   :  { %1805 = vmatprep.subr.bf16.mxu0 %v3378_v59  ;;  %1955 = vmatprep.subr.bf16.mxu1 %v3379_v44  ;;  %v3380_v59 = vpack.c.bf16 %v2346_v27, %v2340_v23  ;;  %v2769_v55 = vsub.f32 %v935_v15, %v990_v38  ;;  %v3381_v61 = vpack.c.bf16 %v2352_v30, %v2350_v29  ;;  %v3382_v29 = vld [vmem:[#allocation18_spill] sm:$0xff]  ;;  %v3383_v30 = vld [vmem:[#allocation19_spill] sm:$0xff]  ;;  %v3299_v28 = vand.u32 4294901760, %v2767_v45 }
  0x55   :  { %v3300_v60 = vand.u32 4294901760, %v2756_v37  ;;  %v1117_v52 = vsub.f32 %v2745_v32, %v3301_v58  ;;  %v3296_v23 = vand.u32 4294901760, %v2761_v13  ;;  %v2780_v27 = vsub.f32 %v936_v17, %v993_v25 }
  0x56   :  { %v2788_v47 = vpack.c.bf16 %v987_v18, %v984_v42  ;;  %v996_v21 = vand.u32 4294901760, %v937_v36  ;;  %v1816_v8 = vpack.c.bf16 %v2428_v24, %v2426_v62  ;;  %v3298_v15 = vand.u32 4294901760, %v2769_v55 }
  0x57   :  { %1807 = vmatpush1.bf16.msra.mxu0 %v3380_v59  ;;  %1957 = vmatpush1.bf16.msra.mxu1 %v1956_v0  ;;  %v1814_v0 = vpack.c.bf16 %v3383_v30, %v3382_v29  ;;  %v1124_v57 = vsub.f32 %v2756_v37, %v3300_v60  ;;  %v1131_v42 = vsub.f32 %v2761_v13, %v3296_v23  ;;  %v999_v17 = vand.u32 4294901760, %v938_v10  ;;  %v3386_v60 = vld [vmem:[#allocation3_spill] sm:$0xff] }
  0x58   :  { %1809 = vmatprep.subr.bf16.mxu0 %v3381_v61  ;;  %1958 = vmatprep.subr.bf16.mxu1 %v3379_v44  ;;  %v3384_v18 = vpack.c.bf16 %v2359_v34, %v2357_v33  ;;  %v1962_v59 = vpack.c.bf16 %v1111_v40, %v1104_v1  ;;  %v1138_v61 = vsub.f32 %v2767_v45, %v3299_v28  ;;  %v3297_v29 = vand.u32 4294901760, %v2780_v27  ;;  %v2817_v33 = vld [vmem:[%s3214_s3 + $0x80] sm:$0xff]  ;;  %v2822_v34 = vld [vmem:[%s3214_s3 + $0x88] sm:$0xff] }
  0x59   :  { %v2810_v30 = vsub.f32 %v937_v36, %v996_v21  ;;  %v1118_v62 = vand.u32 4294901760, %v1117_v52  ;;  %v1125_v24 = vand.u32 4294901760, %v1124_v57  ;;  %v2812_v23 = vsub.f32 %v938_v10, %v999_v17 }
  0x5a   :  { %v2824_v1 = vpack.c.bf16 %v993_v25, %v990_v38  ;;  %v1145_v40 = vsub.f32 %v2769_v55, %v3298_v15  ;;  %v3309_v52 = vand.u32 4294901760, %v2817_v33  ;;  %v3306_v36 = vand.u32 4294901760, %v2822_v34 }
  0x5b   :  { %1811 = vmatpush1.bf16.msra.mxu0 %v3384_v18  ;;  %1960 = vmatpush1.bf16.msra.mxu1 %v1959_v51  ;;  %v1132_v51 = vand.u32 4294901760, %v1131_v42  ;;  %v1139_v10 = vand.u32 4294901760, %v1138_v61  ;;  %v1152_v38 = vsub.f32 %v2780_v27, %v3297_v29  ;;  %v3303_v25 = vand.u32 4294901760, %v2810_v30  ;;  %v2852_v42 = vld [vmem:[%s3214_s3 + $0x98] sm:$0xff] }
  0x5c   :  { %1813 = vmatprep.subr.bf16.mxu0 %v1812_v50  ;;  %v1818_v50 = vpack.c.bf16 %v2499_v3, %v2471_v35  ;;  %1961 = vmatprep.subr.bf16.mxu1 %v3379_v44  ;;  %v3302_v35 = vand.u32 4294901760, %v2812_v23  ;;  %v1965_v3 = vpack.c.bf16 %v1125_v24, %v1118_v62  ;;  %v2842_v57 = vsub.f32 %v2817_v33, %v3309_v52  ;;  %v3393_v52 = vld [vmem:[#allocation8_spill] sm:$0xff] }
  0x5d   :  { %v1146_v61 = vand.u32 4294901760, %v1145_v40  ;;  %v2862_v62 = vpack.c.bf16 %v999_v17, %v996_v21  ;;  %v1968_v24 = vpack.c.bf16 %v1139_v10, %v1132_v51  ;;  %v1153_v29 = vand.u32 4294901760, %v1152_v38  ;;  %v3389_v51 = vld [vmem:[#allocation4_spill] sm:$0xff] }
  0x5e   :  { %v1159_v15 = vsub.f32 %v2810_v30, %v3303_v25  ;;  %v1166_v28 = vsub.f32 %v2812_v23, %v3302_v35  ;;  %v3307_v58 = vand.u32 4294901760, %v2842_v57  ;;  %v3390_v35 = vld [vmem:[#allocation5_spill] sm:$0xff] }
  0x5f   :  { %1815 = vmatpush1.bf16.msra.mxu0 %v1814_v0  ;;  %1963 = vmatpush1.bf16.msra.mxu1 %v1962_v59  ;;  %v2847_v0 = vld [vmem:[%s3214_s3 + $0x90] sm:$0xff]  ;;  %v3304_v59 = vand.u32 4294901760, %v2852_v42  ;;  %v1971_v10 = vpack.c.bf16 %v1153_v29, %v1146_v61  ;;  %v3391_v29 = vld [vmem:[#allocation6_spill] sm:$0xff] }
  0x60   :  { %1817 = vmatprep.subr.bf16.mxu0 %v1816_v8  ;;  %1964 = vmatprep.subr.bf16.mxu1 %v3379_v44  ;;  %v2858_v8 = vsub.f32 %v2822_v34, %v3306_v36  ;;  %v3305_v18 = vand.u32 4294901760, %v2847_v0  ;;  %v1160_v38 = vand.u32 4294901760, %v1159_v15  ;;  %v1173_v25 = vsub.f32 %v2842_v57, %v3307_v58  ;;  %v3392_v15 = vld [vmem:[#allocation7_spill] sm:$0xff] }
  0x61   :  { %v2881_v17 = vsub.f32 %v2852_v42, %v3304_v59 }
  0x62   :  { %3385 = vst [vmem:[#allocation16_spill] sm:$0xff] %v2858_v8  ;;  %v3308_v40 = vand.u32 4294901760, %v2858_v8  ;;  %v2876_v21 = vsub.f32 %v2847_v0, %v3305_v18  ;;  %v1174_v61 = vand.u32 4294901760, %v1173_v25  ;;  %v3395_v25 = vld [vmem:[#allocation10_spill] sm:$0xff] }
  0x63   :  { %1819 = vmatpush1.bf16.msra.mxu0 %v1818_v50  ;;  %1966 = vmatpush1.bf16.msra.mxu1 %v1965_v3  ;;  %3387 = vst [vmem:[#allocation18_spill] sm:$0xff] %v2881_v17  ;;  %v3388_v50 = vld [vmem:[#allocation20_spill] sm:$0xff]  ;;  %v1167_v3 = vand.u32 4294901760, %v1166_v28  ;;  %v3313_v36 = vand.u32 4294901760, %v2881_v17 }
  0x64   :  { %1821 = vmatprep.subr.bf16.mxu0 %v3386_v60  ;;  %1967 = vmatprep.subr.bf16.mxu1 %v3379_v44  ;;  %v1180_v59 = vsub.f32 %v2858_v8, %v3308_v40  ;;  %v3312_v18 = vand.u32 4294901760, %v2876_v21  ;;  %v3394_v8 = vld [vmem:[#allocation9_spill] sm:$0xff] }
  0x65   :  { %v1974_v28 = vpack.c.bf16 %v1167_v3, %v1160_v38  ;;  %v1194_v40 = vsub.f32 %v2881_v17, %v3313_v36  ;;  %v3397_v36 = vld [vmem:[#allocation12_spill] sm:$0xff]  ;;  %v3398_v17 = vld [vmem:[#allocation13_spill] sm:$0xff] }
  0x66   :  { %537 = vmatmul.mubr.f32.vlgmr.msra.gmra.mrb[0].mxu0 %v3388_v50  ;;  %v1187_v58 = vsub.f32 %v2876_v21, %v3312_v18 }
  0x67   :  { %1823 = vmatpush1.bf16.msra.mxu0 %v3389_v51  ;;  %639 = vmatprep.mubr.f32.mxu0 %v3371_v41 }
  0x68   :  { %1825 = vmatprep.subr.bf16.mxu0 %v3390_v35  ;;  %1969 = vmatpush1.bf16.msra.mxu1 %v1968_v24  ;;  %v1181_v24 = vand.u32 4294901760, %v1180_v59  ;;  %v1188_v3 = vand.u32 4294901760, %v1187_v58  ;;  %v3396_v59 = vld [vmem:[#allocation11_spill] sm:$0xff] }
  0x69   :  { %1970 = vmatprep.subr.bf16.mxu1 %v3379_v44  ;;  %v3400_v58 = vld [vmem:[#allocation15_spill] sm:$0xff] }
  0x6a   :  { %v1977_v38 = vpack.c.bf16 %v1181_v24, %v1174_v61  ;;  %v3402_v61 = vld [vmem:[#allocation21_spill] sm:$0xff]  ;;  %v3403_v24 = vld [vmem:[#allocation22_spill] sm:$0xff] }
  0x6b   :  { %1827 = vmatpush1.bf16.msra.mxu0 %v3391_v29 }
  0x6c   :  { %1829 = vmatprep.subr.bf16.mxu0 %v3392_v15  ;;  %1972 = vmatpush1.bf16.msra.mxu1 %v1971_v10  ;;  %v1195_v10 = vand.u32 4294901760, %v1194_v40  ;;  %v3401_v40 = vld [vmem:[#allocation17_spill] sm:$0xff] }
  0x6d   :  { %1973 = vmatprep.subr.bf16.mxu1 %v3379_v44 }
  0x6e   :  { %v1980_v18 = vpack.c.bf16 %v1195_v10, %v1188_v3 }
  0x6f   :  { %1831 = vmatpush1.bf16.msra.mxu0 %v3393_v52 }
  0x70   :  { %1833 = vmatprep.subr.bf16.mxu0 %v3394_v8  ;;  %1975 = vmatpush1.bf16.msra.mxu1 %v1974_v28  ;;  %v3399_v28 = vld [vmem:[#allocation14_spill] sm:$0xff] }
  0x71   :  { %1976 = vmatprep.subr.bf16.mxu1 %v3379_v44 }
  0x73   :  { %1835 = vmatpush1.bf16.msra.mxu0 %v3395_v25 }
  0x74   :  { %1837 = vmatprep.subr.bf16.mxu0 %v3396_v59  ;;  %1978 = vmatpush1.bf16.msra.mxu1 %v1977_v38  ;;  %v3404_v38 = vand.u32 4294901760, %v3388_v50 }
  0x75   :  { %1979 = vmatprep.subr.bf16.mxu1 %v3379_v44 }
  0x77   :  { %1839 = vmatpush1.bf16.msra.mxu0 %v3397_v36 }
  0x78   :  { %1841 = vmatprep.subr.bf16.mxu0 %v3398_v17  ;;  %1981 = vmatpush1.bf16.msra.mxu1 %v1980_v18  ;;  %v3406_v18 = vld [vmem:[#allocation24_spill] sm:$0xff] }
  0x79   :  { %1982 = vmatprep.subr.bf16.mxu1 %v3379_v44 }
  0x7b   :  { %1843 = vmatpush1.bf16.msra.mxu0 %v3399_v28 }
  0x7c   :  { %1845 = vmatprep.subr.bf16.mxu0 %v3400_v58 }
  0x7f   :  { %1847 = vmatpush1.bf16.msra.mxu0 %v3401_v40 }
  0x80   :  { %1849 = vmatprep.subr.bf16.mxu0 %v3402_v61 }
  0x83   :  { %1851 = vmatpush1.bf16.msra.mxu0 %v3403_v24 }
  0x84   :  { %1853 = vmatprep.subr.bf16.mxu0 %v2540_v7  ;;  %v3405_v7 = vld [vmem:[#allocation23_spill] sm:$0xff] }
  0x86   :  { %643 = vmatmul.mubr.f32.vlgmr.msra.gmra.mrb[0].mxu0 %v3404_v38 }
  0x87   :  { %1855 = vmatpush1.bf16.msra.mxu0 %v2546_v9  ;;  %809 = vmatprep.mubr.f32.mxu0 %v3371_v41  ;;  %v944_v9 = vld [vmem:[%s3214_s3 + $0xa8] sm:$0xff] }
  0x88   :  { %1857 = vmatprep.subr.bf16.mxu0 %v2552_v49 }
  0x8b   :  { %1859 = vmatpush1.bf16.msra.mxu0 %v2558_v43  ;;  %v1017_v43 = vand.u32 4294901760, %v944_v9 }
  0x8c   :  { %1861 = vmatprep.subr.bf16.mxu0 %v2564_v11 }
  0x8f   :  { %1863 = vmatpush1.bf16.msra.mxu0 %v2570_v14  ;;  %v2983_v14 = vsub.f32 %v944_v9, %v1017_v43 }
  0x90   :  { %1865 = vmatprep.subr.bf16.mxu0 %v2576_v56  ;;  %v945_v56 = vld [vmem:[%s3214_s3 + $0xb0] sm:$0xff] }
  0x93   :  { %1867 = vmatpush1.bf16.msra.mxu0 %v2582_v53  ;;  %v946_v53 = vld [vmem:[%s3214_s3 + $0xb8] sm:$0xff] }
  0x94   :  { %1869 = vmatprep.subr.bf16.mxu0 %v3405_v7  ;;  %v54_v7 = vld [vmem:[%s3215_s2] sm:$0x3] }
  0x97   :  { %1871 = vmatpush1.bf16.msra.mxu0 %v3406_v18 }
  0x98   :  { %1873 = vmatprep.subr.bf16.mxu0 %v2600_v63  ;;  %v1207_v63 = vand.u32 4294901760, %v2983_v14 }
  0x9b   :  { %1875 = vmatpush1.bf16.msra.mxu0 %v2606_v6  ;;  %v1020_v6 = vand.u32 4294901760, %v945_v56 }
  0x9c   :  { %1877 = vmatprep.subr.bf16.mxu0 %v2610_v20  ;;  %v1023_v20 = vand.u32 4294901760, %v946_v53 }
  0x9f   :  { %1879 = vmatpush1.bf16.msra.mxu0 %v2612_v22 }
  0xa0   :  { %1881 = vmatprep.subr.bf16.mxu0 %v2614_v46  ;;  %v1208_v46 = vsub.f32 %v2983_v14, %v1207_v63 }
  0xa3   :  { %1883 = vmatpush1.bf16.msra.mxu0 %v2616_v12 }
  0xa4   :  { %1885 = vmatprep.subr.bf16.mxu0 %v3386_v60  ;;  %v3001_v60 = vsub.f32 %v946_v53, %v1023_v20 }
  0xa6   :  { %811 = vmatmul.mubr.f32.vlgmr.msra.gmra.mrb[0].mxu0 %v2373_v48 }
  0xa7   :  { %1887 = vmatpush1.bf16.msra.mxu0 %v3389_v51  ;;  %913 = vmatprep.mubr.f32.mxu0 %v3371_v41  ;;  %v2999_v41 = vsub.f32 %v945_v56, %v1020_v6  ;;  %v3407_v51 = vand.u32 4294901760, %v2817_v33  ;;  %v3409_v33 = vand.u32 4294901760, %v2847_v0 }
  0xa8   :  { %1889 = vmatprep.subr.bf16.mxu0 %v3390_v35 }
  0xa9   :  { %v1214_v35 = vand.u32 4294901760, %v2999_v41 }
  0xab   :  { %1891 = vmatpush1.bf16.msra.mxu0 %v3391_v29  ;;  %v1215_v50 = vsub.f32 %v2999_v41, %v1214_v35  ;;  %v3408_v29 = vand.u32 4294901760, %v2822_v34  ;;  %v3410_v34 = vand.u32 4294901760, %v2852_v42  ;;  %v2022_v42 = vpack.c.bf16 %v3001_v60, %v2999_v41 }
  0xac   :  { %1893 = vmatprep.subr.bf16.mxu0 %v3392_v15 }
  0xad   :  { %v3012_v15 = vpack.c.bf16 %v3408_v29, %v3407_v51  ;;  %v1216_v10 = vand.u32 4294901760, %v1215_v50  ;;  %v1992_v29 = vpack.c.bf16 %v2679_v4, %v2675_v5 }
  0xaf   :  { %1895 = vmatpush1.bf16.msra.mxu0 %v3393_v52 }
  0xb0   :  { %1897 = vmatprep.subr.bf16.mxu0 %v3394_v8  ;;  %v1221_v8 = vand.u32 4294901760, %v3001_v60 }
  0xb2   :  { %v1222_v3 = vsub.f32 %v3001_v60, %v1221_v8 }
  0xb3   :  { %1899 = vmatpush1.bf16.msra.mxu0 %v3395_v25 }
  0xb4   :  { %1901 = vmatprep.subr.bf16.mxu0 %v3396_v59  ;;  %v1223_v25 = vand.u32 4294901760, %v1222_v3 }
  0xb6   :  { %v1986_v59 = vpack.c.bf16 %v1223_v25, %v1216_v10 }
  0xb7   :  { %1903 = vmatpush1.bf16.msra.mxu0 %v3397_v36  ;;  %v1209_v36 = vand.u32 4294901760, %v1208_v46 }
  0xb8   :  { %1905 = vmatprep.subr.bf16.mxu0 %v3398_v17 }
  0xbb   :  { %1907 = vmatpush1.bf16.msra.mxu0 %v3399_v28  ;;  %v3024_v28 = vpack.c.bf16 %v3410_v34, %v3409_v33  ;;  %v3411_v33 = vld [vmem:[#allocation25_spill] sm:$0xff]  ;;  %v3412_v34 = vld [vmem:[#allocation26_spill] sm:$0xff] }
  0xbc   :  { %1909 = vmatprep.subr.bf16.mxu0 %v3400_v58 }
  0xbf   :  { %1911 = vmatpush1.bf16.msra.mxu0 %v3401_v40  ;;  %v3033_v40 = vpack.c.bf16 %v1023_v20, %v1020_v6 }
  0xc0   :  { %1913 = vmatprep.subr.bf16.mxu0 %v3402_v61  ;;  %v56_v61 = vlaneseq }
  0xc3   :  { %1915 = vmatpush1.bf16.msra.mxu0 %v3403_v24  ;;  %v57_v24 = vshrl.u32 %v56_v61, 7  ;;  %v1995_v61 = vpack.c.bf16 %v3412_v34, %v3411_v33 }
  0xc4   :  { %1916 = vmatprep.subr.bf16.mxu0 %v3379_v44 }
  0xc5   :  { %v58_v38 = vsub.s32 0, %v57_v24  ;;  %v62_v18 = vsub.s32 1, %v57_v24 }
  0xc6   :  { %915 = vmatmul.mubr.f32.vlgmr.msra.gmra.mrb[0].mxu0 %v2373_v48  ;;  %v943_v48 = vld [vmem:[%s3214_s3 + $0xa0] sm:$0xff] }
  0xc7   :  { %1918 = vmatpush1.bf16.msra.mxu0 %v2677_v16  ;;  %v1014_v49 = vand.u32 4294901760, %v943_v48  ;;  %v63_v9 = vrot.slane %v54_v7, %v62_v18 }
  0xc8   :  { %1919 = vmatprep.subr.bf16.mxu0 %v3379_v44 }
  0xc9   :  { %v2981_v11 = vsub.f32 %v943_v48, %v1014_v49  ;;  %v3029_v58 = vpack.c.bf16 %v1017_v43, %v1014_v49  ;;  %v59_v48 = vrot.slane %v54_v7, %v58_v38  ;;  %v3413_v38 = vld [vmem:[#allocation27_spill] sm:$0xff]  ;;  %v3414_v7 = vld [vmem:[#allocation28_spill] sm:$0xff] }
  0xca   :  { %v1998_v18 = vpack.c.bf16 %v3414_v7, %v3413_v38 }
  0xcb   :  { %1921 = vmatpush1.bf16.msra.mxu0 %v2732_v54  ;;  %v1200_v12 = vand.u32 4294901760, %v2981_v11  ;;  %v2019_v0 = vpack.c.bf16 %v2983_v14, %v2981_v11 }
  0xcc   :  { %1922 = vmatprep.subr.bf16.mxu0 %v3379_v44 }
  0xcd   :  { %v1201_v22 = vsub.f32 %v2981_v11, %v1200_v12 }
  0xcf   :  { %1924 = vmatpush1.bf16.msra.mxu0 %v2747_v26  ;;  %v1202_v52 = vand.u32 4294901760, %v1201_v22 }
  0xd0   :  { %1925 = vmatprep.subr.bf16.mxu0 %v3379_v44 }
  0xd1   :  { %v1983_v17 = vpack.c.bf16 %v1209_v36, %v1202_v52 }
  0xd3   :  { %1927 = vmatpush1.bf16.msra.mxu0 %v2758_v19  ;;  %1984 = vmatpush1.bf16.msra.mxu1 %v1983_v17  ;;  %v1989_v17 = vpack.c.bf16 %v2673_v2, %v2671_v31 }
  0xd4   :  { %1928 = vmatprep.subr.bf16.mxu0 %v3379_v44  ;;  %1985 = vmatprep.subr.bf16.mxu1 %v3379_v44 }
  0xd7   :  { %1930 = vmatpush1.bf16.msra.mxu0 %v2771_v39  ;;  %1987 = vmatpush1.bf16.msra.mxu1 %v1986_v59 }
  0xd8   :  { %1931 = vmatprep.subr.bf16.mxu0 %v3379_v44  ;;  %1988 = vmatprep.subr.bf16.mxu1 %v3379_v44 }
  0xdb   :  { %1933 = vmatpush1.bf16.msra.mxu0 %v2788_v47 }
  0xdc   :  { %1934 = vmatprep.subr.bf16.mxu0 %v3379_v44 }
  0xdf   :  { %1936 = vmatpush1.bf16.msra.mxu0 %v2824_v1 }
  0xe0   :  { %1937 = vmatprep.subr.bf16.mxu0 %v3379_v44 }
  0xe3   :  { %1939 = vmatpush1.bf16.msra.mxu0 %v2862_v62 }
  0xe4   :  { %1940 = vmatprep.subr.bf16.mxu0 %v3379_v44 }
  0xe7   :  { %1942 = vmatpush1.bf16.msra.mxu0 %v3012_v15 }
  0xe8   :  { %1943 = vmatprep.subr.bf16.mxu0 %v3379_v44 }
  0xeb   :  { %1945 = vmatpush1.bf16.msra.mxu0 %v3024_v28 }
  0xec   :  { %1946 = vmatprep.subr.bf16.mxu0 %v3379_v44 }
  0xef   :  { %1948 = vmatpush1.bf16.msra.mxu0 %v3029_v58 }
  0xf0   :  { %1949 = vmatprep.subr.bf16.mxu0 %v3379_v44 }
  0xf3   :  { %1951 = vmatpush1.bf16.msra.mxu0 %v3033_v40 }
 0x199   :  { %v916_v49 = vpop.f32.mrb[0].mxu0 }
 0x19a   :  { %v2132_v43 = vadd.f32 %v916_v49, %v59_v48  ;;  %v918_v56 = vpop.f32.mrb[1].mxu0  ;;  %v2001_v48 = vpack.c.bf16 %v2756_v37, %v2745_v32  ;;  %v2007_v49 = vpack.c.bf16 %v2780_v27, %v2769_v55 }
 0x19b   :  { %v2133_v53 = vadd.f32 %v918_v56, %v63_v9  ;;  %v2004_v9 = vpack.c.bf16 %v2767_v45, %v2761_v13  ;;  %v3415_v56 = vld [vmem:[#allocation16_spill] sm:$0xff] }
 0x19c   :  { %v921_v6 = vmax.f32 %v2132_v43, 0.0  ;;  %v2010_v43 = vpack.c.bf16 %v2812_v23, %v2810_v30 }
 0x19d   :  { %v922_v20 = vmax.f32 %v2133_v53, 0.0  ;;  %v2013_v53 = vpack.c.bf16 %v3415_v56, %v2842_v57 }
 0x19e   :  { %v3043_v22 = vand.u32 4294901760, %v921_v6 }
 0x19f   :  { %v951_v46 = vsel %vm949_vm0, %v922_v20, 0 }
 0x1a0   :  { %v3046_v52 = vsub.f32 %v921_v6, %v3043_v22  ;;  %v3048_v36 = vand.u32 4294901760, %v951_v46  ;;  %v3416_v6 = vld [vmem:[#allocation18_spill] sm:$0xff] }
 0x1a1   :  { %v2016_v20 = vpack.c.bf16 %v3416_v6, %v2876_v21 }
 0x1a2   :  { %v1049_v50 = vand.u32 4294901760, %v3046_v52  ;;  %1242 = vmatprep.mubr.f32.mxu1 %v3048_v36  ;;  %v1042_v51 = vsub.f32 %v951_v46, %v3048_v36 }
 0x1a3   :  { %1244 = vmatmul.mubr.f32.vlgmr.msra.gmra.mrb[0].mxu1 %v3043_v22 }
 0x1a4   :  { %1990 = vmatpush1.bf16.msra.mxu1 %v1989_v17  ;;  %1363 = vmatprep.mubr.f32.mxu1 %v1042_v51  ;;  %v1043_v3 = vand.u32 4294901760, %v1042_v51  ;;  %v1050_v10 = vsub.f32 %v3046_v52, %v1049_v50  ;;  %v3419_v17 = vand.u32 4294901760, %v2675_v5  ;;  %v3425_v5 = vand.u32 4294901760, %v2745_v32 }
 0x1a5   :  { %1991 = vmatprep.subr.bf16.mxu1 %v3379_v44  ;;  %v3431_v32 = vand.u32 4294901760, %v2810_v30  ;;  %v2094_v30 = vpack.c.bf16 %v1221_v8, %v1214_v35 }
 0x1a6   :  { %v1044_v25 = vsub.f32 %v1042_v51, %v1043_v3  ;;  %v1051_v24 = vand.u32 4294901760, %v1050_v10  ;;  %v3420_v51 = vand.u32 4294901760, %v2679_v4  ;;  %v3426_v4 = vand.u32 4294901760, %v2756_v37 }
 0x1a7   :  { %v3432_v37 = vand.u32 4294901760, %v2812_v23  ;;  %v2091_v23 = vpack.c.bf16 %v1207_v63, %v1200_v12 }
 0x1a8   :  { %1993 = vmatpush1.bf16.msra.mxu1 %v1992_v29  ;;  %v1045_v59 = vand.u32 4294901760, %v1044_v25  ;;  %v2064_v29 = vpack.c.bf16 %v3420_v51, %v3419_v17  ;;  %v2073_v25 = vpack.c.bf16 %v3426_v4, %v3425_v5 }
 0x1a9   :  { %1994 = vmatprep.subr.bf16.mxu1 %v3379_v44 }
 0x1aa   :  { %1046 = vmatprep.mubr.f32.mxu0 %v1045_v59  ;;  %v3427_v59 = vand.u32 4294901760, %v2761_v13  ;;  %v3433_v13 = vand.u32 4294901760, %v2842_v57 }
 0x1ab   :  { %1052 = vmatmul.mubr.f32.vlgmr.msra.gmra.mrb[2].mxu0 %v1051_v24  ;;  %v3430_v24 = vand.u32 4294901760, %v2780_v27  ;;  %v3436_v27 = vand.u32 4294901760, %v3416_v6 }
 0x1ac   :  { %1996 = vmatpush1.bf16.msra.mxu1 %v1995_v61  ;;  %v3429_v61 = vand.u32 4294901760, %v2769_v55  ;;  %v3435_v55 = vand.u32 4294901760, %v2876_v21 }
 0x1ad   :  { %1997 = vmatprep.subr.bf16.mxu1 %v3379_v44 }
 0x1b0   :  { %1999 = vmatpush1.bf16.msra.mxu1 %v1998_v18 }
 0x1b1   :  { %2000 = vmatprep.subr.bf16.mxu1 %v3379_v44 }
 0x1b4   :  { %2002 = vmatpush1.bf16.msra.mxu1 %v2001_v48  ;;  %v2088_v48 = vpack.c.bf16 %v3436_v27, %v3435_v55 }
 0x1b5   :  { %2003 = vmatprep.subr.bf16.mxu1 %v3379_v44 }
 0x1b8   :  { %2005 = vmatpush1.bf16.msra.mxu1 %v2004_v9 }
 0x1b9   :  { %2006 = vmatprep.subr.bf16.mxu1 %v3379_v44 }
 0x1bc   :  { %2008 = vmatpush1.bf16.msra.mxu1 %v2007_v49 }
 0x1bd   :  { %2009 = vmatprep.subr.bf16.mxu1 %v3379_v44 }
 0x1c0   :  { %2011 = vmatpush1.bf16.msra.mxu1 %v2010_v43 }
 0x1c1   :  { %2012 = vmatprep.subr.bf16.mxu1 %v3379_v44 }
 0x1c4   :  { %2014 = vmatpush1.bf16.msra.mxu1 %v2013_v53 }
 0x1c5   :  { %2015 = vmatprep.subr.bf16.mxu1 %v3379_v44 }
 0x1c8   :  { %2017 = vmatpush1.bf16.msra.mxu1 %v2016_v20 }
 0x1c9   :  { %2018 = vmatprep.subr.bf16.mxu1 %v3379_v44 }
 0x1cc   :  { %2020 = vmatpush1.bf16.msra.mxu1 %v2019_v0  ;;  %v3417_v0 = vand.u32 4294901760, %v2671_v31  ;;  %v3421_v31 = vand.u32 4294901760, %v3411_v33  ;;  %v3428_v33 = vand.u32 4294901760, %v2767_v45  ;;  %v3434_v45 = vand.u32 4294901760, %v3415_v56 }
 0x1cd   :  { %2021 = vmatprep.subr.bf16.mxu1 %v3379_v44 }
 0x1ce   :  { %v2085_v18 = vpack.c.bf16 %v3434_v45, %v3433_v13 }
 0x1d0   :  { %2023 = vmatpush1.bf16.msra.mxu1 %v2022_v42  ;;  %v3418_v42 = vand.u32 4294901760, %v2673_v2  ;;  %v3422_v2 = vand.u32 4294901760, %v3412_v34  ;;  %v2076_v34 = vpack.c.bf16 %v3428_v33, %v3427_v59 }
 0x1d1   :  { %2024 = vmatprep.subr.bf16.mxu1 %v3379_v44 }
 0x1d2   :  { %v2061_v46 = vpack.c.bf16 %v3418_v42, %v3417_v0 }
 0x1d3   :  { %1366 = vmatmul.mubr.f32.vlgmr.msra.gmra.mrb[0].mxu1 %v3046_v52  ;;  %v3423_v52 = vand.u32 4294901760, %v3413_v38  ;;  %v2079_v38 = vpack.c.bf16 %v3430_v24, %v3429_v61 }
 0x1d4   :  { %2026 = vmatpush1.bf16.msra.mxu1 %v2677_v16  ;;  %1462 = vmatprep.mubr.f32.mxu1 %v1043_v3  ;;  %v2067_v3 = vpack.c.bf16 %v3422_v2, %v3421_v31 }
 0x1d5   :  { %2027 = vmatprep.subr.bf16.mxu1 %v3379_v44 }
 0x1d8   :  { %2029 = vmatpush1.bf16.msra.mxu1 %v2732_v54 }
 0x1d9   :  { %2030 = vmatprep.subr.bf16.mxu1 %v3379_v44 }
 0x1dc   :  { %2032 = vmatpush1.bf16.msra.mxu1 %v2747_v26 }
 0x1dd   :  { %2033 = vmatprep.subr.bf16.mxu1 %v3379_v44 }
 0x1e0   :  { %2035 = vmatpush1.bf16.msra.mxu1 %v2758_v19 }
 0x1e1   :  { %2036 = vmatprep.subr.bf16.mxu1 %v3379_v44 }
 0x1e4   :  { %2038 = vmatpush1.bf16.msra.mxu1 %v2771_v39 }
 0x1e5   :  { %2039 = vmatprep.subr.bf16.mxu1 %v3379_v44 }
 0x1e8   :  { %2041 = vmatpush1.bf16.msra.mxu1 %v2788_v47 }
 0x1e9   :  { %2042 = vmatprep.subr.bf16.mxu1 %v3379_v44 }
 0x1ec   :  { %2044 = vmatpush1.bf16.msra.mxu1 %v2824_v1 }
 0x1ed   :  { %2045 = vmatprep.subr.bf16.mxu1 %v3379_v44 }
 0x1f0   :  { %2047 = vmatpush1.bf16.msra.mxu1 %v2862_v62 }
 0x1f1   :  { %2048 = vmatprep.subr.bf16.mxu1 %v3379_v44 }
 0x1f4   :  { %2050 = vmatpush1.bf16.msra.mxu1 %v3012_v15 }
 0x1f5   :  { %2051 = vmatprep.subr.bf16.mxu1 %v3379_v44 }
 0x1f8   :  { %2053 = vmatpush1.bf16.msra.mxu1 %v3024_v28 }
 0x1f9   :  { %2054 = vmatprep.subr.bf16.mxu1 %v3379_v44 }
 0x1fc   :  { %2056 = vmatpush1.bf16.msra.mxu1 %v3029_v58 }
 0x1fd   :  { %2057 = vmatprep.subr.bf16.mxu1 %v3379_v44 }
 0x200   :  { %2059 = vmatpush1.bf16.msra.mxu1 %v3033_v40 }
 0x201   :  { %2060 = vmatprep.subr.bf16.mxu1 %v3379_v44 }
 0x203   :  { %1466 = vmatmul.mubr.f32.vlgmr.msra.gmra.mrb[0].mxu1 %v1049_v50  ;;  %v3424_v50 = vand.u32 4294901760, %v3414_v7  ;;  %v2082_v7 = vpack.c.bf16 %v3432_v37, %v3431_v32 }
 0x204   :  { %2062 = vmatpush1.bf16.msra.mxu1 %v2061_v46  ;;  %1608 = vmatprep.mubr.f32.mxu1 %v3048_v36 }
 0x205   :  { %2063 = vmatprep.subr.bf16.mxu1 %v3379_v44  ;;  %v2070_v10 = vpack.c.bf16 %v3424_v50, %v3423_v52 }
 0x208   :  { %2065 = vmatpush1.bf16.msra.mxu1 %v2064_v29 }
 0x209   :  { %2066 = vmatprep.subr.bf16.mxu1 %v3379_v44 }
 0x20c   :  { %2068 = vmatpush1.bf16.msra.mxu1 %v2067_v3 }
 0x20d   :  { %2069 = vmatprep.subr.bf16.mxu1 %v3379_v44 }
 0x210   :  { %2071 = vmatpush1.bf16.msra.mxu1 %v2070_v10 }
 0x211   :  { %2072 = vmatprep.subr.bf16.mxu1 %v3379_v44 }
 0x214   :  { %2074 = vmatpush1.bf16.msra.mxu1 %v2073_v25 }
 0x215   :  { %2075 = vmatprep.subr.bf16.mxu1 %v3379_v44 }
 0x218   :  { %2077 = vmatpush1.bf16.msra.mxu1 %v2076_v34 }
 0x219   :  { %2078 = vmatprep.subr.bf16.mxu1 %v3379_v44 }
 0x21c   :  { %2080 = vmatpush1.bf16.msra.mxu1 %v2079_v38 }
 0x21d   :  { %2081 = vmatprep.subr.bf16.mxu1 %v3379_v44 }
 0x220   :  { %2083 = vmatpush1.bf16.msra.mxu1 %v2082_v7 }
 0x221   :  { %2084 = vmatprep.subr.bf16.mxu1 %v3379_v44 }
 0x224   :  { %2086 = vmatpush1.bf16.msra.mxu1 %v2085_v18 }
 0x225   :  { %2087 = vmatprep.subr.bf16.mxu1 %v3379_v44 }
 0x228   :  { %2089 = vmatpush1.bf16.msra.mxu1 %v2088_v48 }
 0x229   :  { %2090 = vmatprep.subr.bf16.mxu1 %v3379_v44 }
 0x22c   :  { %2092 = vmatpush1.bf16.msra.mxu1 %v2091_v23 }
 0x22d   :  { %2093 = vmatprep.subr.bf16.mxu1 %v3379_v44 }
 0x230   :  { %2095 = vmatpush1.bf16.msra.mxu1 %v2094_v30 }
 0x231   :  { %2096 = vmatprep.subr.bf16.mxu1 %v3379_v44 }
 0x233   :  { %1610 = vmatmul.mubr.f32.vlgmr.msra.gmra.mrb[0].mxu1 %v3043_v22 }
 0x234   :  { %2098 = vmatpush1.bf16.msra.mxu1 %v2677_v16  ;;  %1704 = vmatprep.mubr.f32.mxu1 %v3048_v36 }
 0x235   :  { %2099 = vmatprep.subr.bf16.mxu1 %v3379_v44 }
 0x238   :  { %2101 = vmatpush1.bf16.msra.mxu1 %v2732_v54  ;;  %v948_v54 = vstv %s3216_s4 }
 0x239   :  { %2102 = vmatprep.subr.bf16.mxu1 %v3379_v44 }
 0x23c   :  { %2104 = vmatpush1.bf16.msra.mxu1 %v2747_v26 }
 0x23d   :  { %2105 = vmatprep.subr.bf16.mxu1 %v3379_v44 }
 0x240   :  { %2107 = vmatpush1.bf16.msra.mxu1 %v2758_v19 }
 0x241   :  { %2108 = vmatprep.subr.bf16.mxu1 %v3379_v44 }
 0x244   :  { %2110 = vmatpush1.bf16.msra.mxu1 %v2771_v39 }
 0x245   :  { %2111 = vmatprep.subr.bf16.mxu1 %v3379_v44 }
 0x248   :  { %2113 = vmatpush1.bf16.msra.mxu1 %v2788_v47 }
 0x249   :  { %2114 = vmatprep.subr.bf16.mxu1 %v3379_v44 }
 0x24c   :  { %2116 = vmatpush1.bf16.msra.mxu1 %v2824_v1 }
 0x24d   :  { %2117 = vmatprep.subr.bf16.mxu1 %v3379_v44 }
 0x250   :  { %2119 = vmatpush1.bf16.msra.mxu1 %v2862_v62 }
 0x251   :  { %2120 = vmatprep.subr.bf16.mxu1 %v3379_v44 }
 0x254   :  { %2122 = vmatpush1.bf16.msra.mxu1 %v3012_v15 }
 0x255   :  { %2123 = vmatprep.subr.bf16.mxu1 %v3379_v44 }
 0x258   :  { %2125 = vmatpush1.bf16.msra.mxu1 %v3024_v28 }
 0x259   :  { %2126 = vmatprep.subr.bf16.mxu1 %v3379_v44 }
 0x25c   :  { %2128 = vmatpush1.bf16.msra.mxu1 %v3029_v58 }
 0x25d   :  { %2129 = vmatprep.subr.bf16.mxu1 %v3379_v44 }
 0x260   :  { %2131 = vmatpush1.bf16.msra.mxu1 %v3033_v40 }
 0x263   :  { %1706 = vmatmul.mubr.f32.vlgmr.msra.gmra.mrb[0].mxu1 %v3043_v22 }
 0x27e   :  { %v1053_v26 = vpop.f32.mrb[2].mxu0 }
 0x27f   :  { %v1055_v16 = vpop.f32.mrb[3].mxu0  ;;  %v1054_v19 = vadd.f32 %v1053_v26, %v948_v54 }
 0x336   :  { %v1707_v39 = vpop.f32.mrb[0].mxu1 }
 0x337   :  { %v2135_v47 = vadd.f32 %v1707_v39, %v1054_v19  ;;  %v1709_v1 = vpop.f32.mrb[1].mxu1 }
 0x339   :  { %v1723_v57 = vmul.f32 -1.442695, %v2135_v47 }
 0x33b   :  { %2156 = vpow2.f32 %v1723_v57 }
 0x345   :  { %v2157_v62 = vpop.eup %2156 }
 0x346   :  { %v1714_v21 = vadd.f32 1.0, %v2157_v62 }
 0x348   :  { %2158 = vrcp.f32 %v1714_v21 }
 0x352   :  { %v2159_v44 = vpop.eup %2158 }
 0x353   :  { %1718 = vst.msk [vmem:[%s3217_s5] sm:$0xf] %vm1717_vm1, %v2159_v44 }

</bundles_post_ra>
